<compile_context>
chip_gen: v7x
topology: tpu7x:2x2x1
jax: 0.10.0
libtpu: 0.0.40
codegen_flags: <defaults>
</compile_context>

<pallas_src>
import functools

import jax
import jax.numpy as jnp
from jax import lax
from jax.experimental import pallas as pl
from jax.experimental.pallas import tpu as pltpu


# ---------------------------------------------------------------------------
# Exact PyTorch bilinear (align_corners=False) interpolation matrix.
# ---------------------------------------------------------------------------
def bilinear_matrix(in_size: int, out_size: int) -> jnp.ndarray:
    scale = in_size / out_size
    dst = jnp.arange(out_size, dtype=jnp.float32)
    src = (dst + 0.5) * scale - 0.5
    src = jnp.maximum(src, 0.0)                           # PyTorch clamps negative coords
    i0 = jnp.clip(jnp.floor(src).astype(jnp.int32), 0, in_size - 1)
    i1 = jnp.minimum(i0 + 1, in_size - 1)
    w1 = src - i0.astype(jnp.float32)
    w0 = 1.0 - w1
    rows = jnp.arange(out_size)
    m = jnp.zeros((out_size, in_size), jnp.float32)
    m = m.at[rows, i0].add(w0)
    m = m.at[rows, i1].add(w1)
    return m


# ---------------------------------------------------------------------------
# mean(top-3) of a 2D map: per-position running-top-3 fold over 8-row chunks,
# then exact 3-pass extraction on the small candidate slab.  Value semantics
# (duplicates included) match torch.topk(3).values.mean().
# ---------------------------------------------------------------------------
def _top3_mean(smap):
    OH, OW = smap.shape
    SUB = 8                                   # f32 sublanes; OH = 16*H is a multiple of 8
    a = smap[0:SUB, :]
    neg = jnp.full((SUB, OW), -jnp.inf, dtype=smap.dtype)
    b = neg
    c = neg
    for k in range(1, OH // SUB):             # 5 elementwise ops per chunk, VPU only
        r = smap[k * SUB:(k + 1) * SUB, :]
        a, t = jnp.maximum(a, r), jnp.minimum(a, r)
        b, t = jnp.maximum(b, t), jnp.minimum(b, t)
        c = jnp.maximum(c, t)
    cand = jnp.concatenate([a, b, c], axis=0)           # (3*SUB, OW): holds global top-3
    ri = lax.broadcasted_iota(jnp.int32, cand.shape, 0)
    ci = lax.broadcasted_iota(jnp.int32, cand.shape, 1)
    flat = ri * OW + ci
    big = cand.shape[0] * OW
    acc = jnp.float32(0.0)
    s = cand
    for _ in range(3):                        # exact-equality match is valid: max is exact
        v = jnp.max(s)
        idx = jnp.min(jnp.where(s == v, flat, big))
        s = jnp.where(flat == idx, -jnp.inf, s)          # remove exactly one occurrence
        acc = acc + v
    return acc * (1.0 / 3.0)


# ---------------------------------------------------------------------------
# Fused per-grid-step kernel (block_n images per step):
#   conv1x1 (MXU) -> bilinear upsample (2 MXU matmuls) -> sigmoid
#   -> saliency store + top-3 mean
#   + adaptive avg pool (MXU) -> projector (Linear/ReLU/Linear/L2-normalize)
# ---------------------------------------------------------------------------
def _fused_kernel(feat_ref, uh_ref, uwt_ref, wsalt_ref,
                  w1_ref, b1_ref, w2_ref, b2_ref,
                  sal_ref, inst_ref, proj_ref):
    Bb, NF, HW = feat_ref.shape
    OH, H = uh_ref.shape
    W, OW = uwt_ref.shape
    C = wsalt_ref.shape[0]

    uh = uh_ref[...]                                      # (OH, H)  f32
    uwt = uwt_ref[...]                                    # (W, OW)  f32  (= uw^T)
    wsalt = wsalt_ref[...]                                # (C, NF)  bf16
    ones_row = jnp.ones((1, HW), dtype=feat_ref.dtype)    # bf16
    inv_hw = jnp.float32(1.0 / HW)

    pooled_rows = []
    for b in range(Bb):
        feat_b = feat_ref[b]                              # (NF, HW) bf16, NCHW order

        # --- 1x1 conv (no bias) on the MXU, applied BEFORE the upsample -----
        logits = jnp.dot(wsalt, feat_b,
                         preferred_element_type=jnp.float32)          # (C, HW) f32

        for c in range(C):                                # num_classes is tiny (1)
            # un-flatten class-c logits: lane-vector (HW,) -> (H, W)
            L = jnp.concatenate(
                [logits[c:c + 1, h * W:(h + 1) * W] for h in range(H)], axis=0)

            # bilinear x16 upsample as two plain MXU matmuls
            rowup = jnp.dot(uh, L, preferred_element_type=jnp.float32)    # (OH, W)
            up = jnp.dot(rowup, uwt, preferred_element_type=jnp.float32)  # (OH, OW)
            smap = jax.nn.sigmoid(up)
            sal_ref[b, c] = smap.astype(sal_ref.dtype)    # lane-dense NCHW store

            v = _top3_mean(smap).reshape(1, 1)
            inst_row = v if c == 0 else jnp.concatenate([inst_row, v], axis=1)
        inst_ref[b] = inst_row                            # (1, C)

        # --- AdaptiveAvgPool2d((1,1)) on the MXU (contract HW of both) ------
        pooled = lax.dot_general(ones_row, feat_b, (((1,), (1,)), ((), ())),
                                 preferred_element_type=jnp.float32) * inv_hw  # (1, NF)
        pooled_rows.append(pooled)

    pooled_all = pooled_rows[0] if Bb == 1 else jnp.concatenate(pooled_rows, axis=0)

    # --- projector: Linear(nf,512) -> ReLU -> Linear(512,feat_dim) -> L2 norm ---
    z = jnp.dot(pooled_all.astype(jnp.bfloat16), w1_ref[...],
                preferred_element_type=jnp.float32) + b1_ref[...]
    z = jnp.maximum(z, 0.0)
    p = jnp.dot(z.astype(jnp.bfloat16), w2_ref[...],
                preferred_element_type=jnp.float32) + b2_ref[...]
    ss = jnp.sum(p * p, axis=1, keepdims=True)
    # F.normalize(dim=1): p / max(||p||, 1e-12)  ==  p * rsqrt(max(||p||^2, 1e-24))
    p = p * lax.rsqrt(jnp.maximum(ss, 1e-24))
    proj_ref[...] = p.reshape(Bb, 1, p.shape[-1])


def fused_forward(feat2, u_h, u_w_t, w_sal_t, w1, b1, w2, b2, *, block_n):
    Np, NF, HW = feat2.shape
    OH, Hdim = u_h.shape
    Wdim, OW = u_w_t.shape
    C = w_sal_t.shape[0]
    HID = w1.shape[1]
    FD = w2.shape[1]

    sal, inst, proj = pl.pallas_call(
        _fused_kernel,
        out_shape=(
            jax.ShapeDtypeStruct((Np, C, OH, OW), jnp.float32),   # saliency maps (NCHW)
            jax.ShapeDtypeStruct((Np, 1, C), jnp.float32),        # instance predictions
            jax.ShapeDtypeStruct((Np, 1, FD), jnp.float32),       # projected features
        ),
        grid_spec=pltpu.PrefetchScalarGridSpec(
            num_scalar_prefetch=0,
            grid=(Np // block_n,),
            in_specs=[
                pl.BlockSpec((block_n, NF, HW), lambda n: (n, 0, 0)),
                pl.BlockSpec((OH, Hdim), lambda n: (0, 0)),
                pl.BlockSpec((Wdim, OW), lambda n: (0, 0)),
                pl.BlockSpec((C, NF), lambda n: (0, 0)),
                pl.BlockSpec((NF, HID), lambda n: (0, 0)),
                pl.BlockSpec((1, HID), lambda n: (0, 0)),
                pl.BlockSpec((HID, FD), lambda n: (0, 0)),
                pl.BlockSpec((1, FD), lambda n: (0, 0)),
            ],
            out_specs=[
                pl.BlockSpec((block_n, C, OH, OW), lambda n: (n, 0, 0, 0)),
                pl.BlockSpec((block_n, 1, C), lambda n: (n, 0, 0)),
                pl.BlockSpec((block_n, 1, FD), lambda n: (n, 0, 0)),
            ],
        ),
        compiler_params=pltpu.CompilerParams(
            dimension_semantics=("parallel",),            # batch blocks -> both TCs on v7x
            vmem_limit_bytes=32 * 1024 * 1024),
    )(feat2, u_h, u_w_t, w_sal_t, w1, b1, w2, b2)
    return sal, inst, proj


# ---------------------------------------------------------------------------
# Module forward (projector / pred_on flags as in the PyTorch module).
# ---------------------------------------------------------------------------
@functools.partial(jax.jit, static_argnames=("projector", "pred_on", "batch_block"))
def embedding_model_forward(feat_nchw, params, projector=False, pred_on=False,
                            batch_block=4):
    # TODO(synk): pretrained timm / EfficientNet-B3 encoder backbone is not translated;
    #             this wrapper consumes the encoder feature map `feat` (NCHW) directly.
    # TODO(synk): Linear_Classifier aggregator (pred_on=True bag path) is not defined
    #             in the reference source; only pred_on=False is implemented.
    assert not pred_on
    N, NF, H, W = feat_nchw.shape

    # Images per grid step: amortize per-step overhead but keep grid length >= 2.
    b_blk = max(1, min(batch_block, (N + 1) // 2))
    n_pad = -(-N // b_blk) * b_blk

    # Only a bf16 cast + minor-dims merge on the big tensor; NO NCHW->NHWC transpose.
    feat2 = feat_nchw.astype(jnp.bfloat16).reshape(N, NF, H * W)
    if n_pad != N:
        feat2 = jnp.pad(feat2, ((0, n_pad - N), (0, 0), (0, 0)))

    u_h = bilinear_matrix(H, 16 * H)                      # (OH, H)
    u_w_t = bilinear_matrix(W, 16 * W).T                  # (W, OW)
    w_sal_t = jnp.asarray(params["w_sal"]).astype(jnp.bfloat16).T    # (C, NF)
    w1 = jnp.asarray(params["w1"]).astype(jnp.bfloat16)   # (NF, HID)
    w2 = jnp.asarray(params["w2"]).astype(jnp.bfloat16)   # (HID, FD)
    b1 = jnp.asarray(params["b1"], jnp.float32).reshape(1, -1)
    b2 = jnp.asarray(params["b2"], jnp.float32).reshape(1, -1)

    sal, inst, proj = fused_forward(feat2, u_h, u_w_t, w_sal_t, w1, b1, w2, b2,
                                    block_n=b_blk)
    saliency_maps = sal[:N]
    inst_nc = inst[:N, 0]                                 # (N, C)
    proj_feat = proj[:N, 0]                               # (N, FD)

    C = w_sal_t.shape[0]
    # torch .squeeze(): drop the class dim when C == 1 (batch dim kept even for N == 1)
    instance_predictions = inst_nc[:, 0] if C == 1 else inst_nc

    bag_pred = None
    bag_instance_predictions = None
    proj_out = proj_feat if projector else saliency_maps
    return bag_pred, bag_instance_predictions, instance_predictions, proj_out


# ---------------------------------------------------------------------------
# Pure-JAX reference (mirrors the PyTorch op order) for a correctness check.
# ---------------------------------------------------------------------------
def reference_forward(feat_nchw, params):
    feat = feat_nchw.astype(jnp.float32)
    N, NF, H, W = feat.shape
    u_h = bilinear_matrix(H, 16 * H)
    u_w = bilinear_matrix(W, 16 * W)
    up = jnp.einsum('ah,nfhw,bw->nfab', u_h, feat, u_w)          # upsample
    logits = jnp.einsum('nfab,fc->ncab', up, params["w_sal"])    # 1x1 conv
    smap = jax.nn.sigmoid(logits)
    C = smap.shape[1]
    flat = smap.reshape(N, C, -1)
    inst = lax.top_k(flat, 3)[0].mean(axis=-1)                   # (N, C)
    inst = inst[:, 0] if C == 1 else inst
    pooled = feat.mean(axis=(2, 3))                              # (N, NF)
    z = jnp.maximum(pooled @ params["w1"] + params["b1"], 0.0)
    p = z @ params["w2"] + params["b2"]
    nrm = jnp.maximum(jnp.linalg.norm(p, axis=1, keepdims=True), 1e-12)
    return smap, inst, p / nrm


if __name__ == "__main__":
    key = jax.random.PRNGKey(0)
    # small stand-ins for (batch, nf=1536, 14, 14); N=3 exercises padding + batching
    N, NF, H, W = 3, 32, 4, 4
    NUM_CLASSES, HID, FEAT_DIM = 1, 64, 16

    k_feat, k_sal, k_w1, k_b1, k_w2, k_b2 = jax.random.split(key, 6)
    feat = jax.random.normal(k_feat, (N, NF, H, W), jnp.float32)   # encoder output, NCHW
    params = {
        "w_sal": jax.random.normal(k_sal, (NF, NUM_CLASSES), jnp.float32) * 0.1,
        "w1": jax.random.normal(k_w1, (NF, HID), jnp.float32) * (1.0 / NF) ** 0.5,
        "b1": jax.random.normal(k_b1, (1, HID), jnp.float32) * 0.01,
        "w2": jax.random.normal(k_w2, (HID, FEAT_DIM), jnp.float32) * (1.0 / HID) ** 0.5,
        "b2": jax.random.normal(k_b2, (1, FEAT_DIM), jnp.float32) * 0.01,
    }

    # default call: projector=False, pred_on=False  -> proj == saliency maps
    bag_pred, bag_inst, inst_pred, proj = embedding_model_forward(
        feat, params, projector=False)
    jax.block_until_ready((inst_pred, proj))

    # projector branch
    _, _, _, proj2 = embedding_model_forward(feat, params, projector=True)
    jax.block_until_ready(proj2)

    assert bag_pred is None and bag_inst is None
    assert proj.shape == (N, NUM_CLASSES, 16 * H, 16 * W)
    assert inst_pred.shape == (N,)
    assert proj2.shape == (N, FEAT_DIM)

    # correctness vs the pure-JAX f32 reference (loose tol: bf16 feats/weights on MXU)
    smap_r, inst_r, proj_r = reference_forward(feat, params)
    jax.block_until_ready((smap_r, inst_r, proj_r))
    assert bool(jnp.allclose(proj, smap_r, rtol=1e-2, atol=1e-2))
    assert bool(jnp.allclose(inst_pred, inst_r, rtol=1e-2, atol=1e-2))
    assert bool(jnp.allclose(proj2, proj_r, rtol=2e-2, atol=2e-2))

    print("KERNEL_OK")
</pallas_src>

<mosaic_0001>
module attributes {stable_mosaic.version = 11 : i64} {
  func.func private @main(%arg0: i32) attributes {dimension_semantics = [#tpu.dimension_semantics<core_parallel>], iteration_bounds = array<i64: 2>, tpu.core_type = #tpu.core_type<sc_scalar_subcore>, window_params = []} {
    return
  }
}

module attributes {stable_mosaic.version = 11 : i64} {
  func.func private @main(%arg0: i32) attributes {dimension_semantics = [#tpu.dimension_semantics<core_parallel>], iteration_bounds = array<i64: 2>, tpu.core_type = #tpu.core_type<sc_scalar_subcore>, window_params = []} {
    return
  }
}

module attributes {stable_mosaic.version = 11 : i64} {
  func.func @_fused_kernel(%arg0: i32, %arg1: memref<2x32x16xbf16, #tpu.memory_space<vmem>>, %arg2: memref<64x4xf32, #tpu.memory_space<vmem>>, %arg3: memref<4x64xf32, #tpu.memory_space<vmem>>, %arg4: memref<1x32xbf16, #tpu.memory_space<vmem>>, %arg5: memref<32x64xbf16, #tpu.memory_space<vmem>>, %arg6: memref<1x64xf32, #tpu.memory_space<vmem>>, %arg7: memref<64x16xbf16, #tpu.memory_space<vmem>>, %arg8: memref<1x16xf32, #tpu.memory_space<vmem>>, %arg9: memref<2x1x64x64xf32, #tpu.memory_space<vmem>>, %arg10: memref<2x1x1xf32, #tpu.memory_space<vmem>>, %arg11: memref<2x1x16xf32, #tpu.memory_space<vmem>>) attributes {dimension_semantics = [#tpu.dimension_semantics<parallel>], iteration_bounds = array<i64: 2>, scalar_prefetch = 0 : i64, scratch_operands = 0 : i64, tpu.core_type = #tpu.core_type<tc>, window_params = [{transform_indices = @transform_0, window_bounds = array<i64: 2, 32, 16>}, {pipeline_mode = #tpu.pipeline_mode<synchronous>, transform_indices = @transform_1, window_bounds = array<i64: 64, 4>}, {pipeline_mode = #tpu.pipeline_mode<synchronous>, transform_indices = @transform_2, window_bounds = array<i64: 4, 64>}, {pipeline_mode = #tpu.pipeline_mode<synchronous>, transform_indices = @transform_3, window_bounds = array<i64: 1, 32>}, {pipeline_mode = #tpu.pipeline_mode<synchronous>, transform_indices = @transform_4, window_bounds = array<i64: 32, 64>}, {pipeline_mode = #tpu.pipeline_mode<synchronous>, transform_indices = @transform_5, window_bounds = array<i64: 1, 64>}, {pipeline_mode = #tpu.pipeline_mode<synchronous>, transform_indices = @transform_6, window_bounds = array<i64: 64, 16>}, {pipeline_mode = #tpu.pipeline_mode<synchronous>, transform_indices = @transform_7, window_bounds = array<i64: 1, 16>}, {transform_indices = @transform_8, window_bounds = array<i64: 2, 1, 64, 64>}, {transform_indices = @transform_9, window_bounds = array<i64: 2, 1, 1>}, {transform_indices = @transform_10, window_bounds = array<i64: 2, 1, 16>}]} {
    %c0 = arith.constant 0 : index
    %c0_0 = arith.constant 0 : index
    %0 = vector.load %arg2[%c0, %c0_0] : memref<64x4xf32, #tpu.memory_space<vmem>>, vector<64x4xf32>
    %c0_1 = arith.constant 0 : index
    %c0_2 = arith.constant 0 : index
    %1 = vector.load %arg3[%c0_1, %c0_2] : memref<4x64xf32, #tpu.memory_space<vmem>>, vector<4x64xf32>
    %c0_3 = arith.constant 0 : index
    %c0_4 = arith.constant 0 : index
    %2 = vector.load %arg4[%c0_3, %c0_4] : memref<1x32xbf16, #tpu.memory_space<vmem>>, vector<1x32xbf16>
    %cst = arith.constant 1.000000e+00 : bf16
    %3 = vector.broadcast %cst : bf16 to vector<1x16xbf16>
    %c0_5 = arith.constant 0 : index
    %c0_6 = arith.constant 0 : index
    %c0_7 = arith.constant 0 : index
    %4 = vector.load %arg1[%c0_5, %c0_6, %c0_7] : memref<2x32x16xbf16, #tpu.memory_space<vmem>>, vector<1x32x16xbf16>
    %5 = vector.shape_cast %4 : vector<1x32x16xbf16> to vector<32x16xbf16>
    %cst_8 = arith.constant dense<0.000000e+00> : vector<1x16xf32>
    %6 = tpu.matmul %2, %5, %cst_8 {dimension_numbers = #tpu.dot_dimension_numbers<[1], [0], [0], [1], [0, 0, 1, 1], [], []>} : vector<1x32xbf16>, vector<32x16xbf16>, vector<1x16xf32> -> vector<1x16xf32>
    %7 = vector.extract_strided_slice %6 {offsets = [0, 0], sizes = [1, 4], strides = [1, 1]} : vector<1x16xf32> to vector<1x4xf32>
    %8 = vector.extract_strided_slice %6 {offsets = [0, 4], sizes = [1, 4], strides = [1, 1]} : vector<1x16xf32> to vector<1x4xf32>
    %9 = vector.extract_strided_slice %6 {offsets = [0, 8], sizes = [1, 4], strides = [1, 1]} : vector<1x16xf32> to vector<1x4xf32>
    %10 = vector.extract_strided_slice %6 {offsets = [0, 12], sizes = [1, 4], strides = [1, 1]} : vector<1x16xf32> to vector<1x4xf32>
    %11 = tpu.concatenate %7, %8, %9, %10 in 0 : vector<1x4xf32>, vector<1x4xf32>, vector<1x4xf32>, vector<1x4xf32> -> vector<4x4xf32>
    %cst_9 = arith.constant dense<0.000000e+00> : vector<64x4xf32>
    %12 = tpu.matmul %0, %11, %cst_9 {dimension_numbers = #tpu.dot_dimension_numbers<[1], [0], [0], [1], [0, 0, 1, 1], [], []>} : vector<64x4xf32>, vector<4x4xf32>, vector<64x4xf32> -> vector<64x4xf32>
    %cst_10 = arith.constant dense<0.000000e+00> : vector<64x64xf32>
    %13 = tpu.matmul %12, %1, %cst_10 {dimension_numbers = #tpu.dot_dimension_numbers<[1], [0], [0], [1], [0, 0, 1, 1], [], []>} : vector<64x4xf32>, vector<4x64xf32>, vector<64x64xf32> -> vector<64x64xf32>
    %14 = arith.negf %13 : vector<64x64xf32>
    %15 = math.exp %14 : vector<64x64xf32>
    %cst_11 = arith.constant 1.000000e+00 : f32
    %16 = vector.broadcast %cst_11 : f32 to vector<64x64xf32>
    %17 = arith.addf %16, %15 : vector<64x64xf32>
    %18 = arith.divf %16, %17 : vector<64x64xf32>
    %c0_12 = arith.constant 0 : index
    %c0_13 = arith.constant 0 : index
    %c0_14 = arith.constant 0 : index
    %c0_15 = arith.constant 0 : index
    %19 = vector.load %arg9[%c0_12, %c0_13, %c0_14, %c0_15] : memref<2x1x64x64xf32, #tpu.memory_space<vmem>>, vector<1x1x64x64xf32>
    %20 = vector.shape_cast %19 : vector<1x1x64x64xf32> to vector<64x64xf32>
    %21 = vector.shape_cast %18 : vector<64x64xf32> to vector<1x1x64x64xf32>
    tpu.vector_store %arg9[%c0_12, %c0_13, %c0_14, %c0_15], %21 {strides = array<i32>} : memref<2x1x64x64xf32, #tpu.memory_space<vmem>>, vector<1x1x64x64xf32>,
    %22 = vector.extract_strided_slice %18 {offsets = [0, 0], sizes = [8, 64], strides = [1, 1]} : vector<64x64xf32> to vector<8x64xf32>
    %cst_16 = arith.constant 0xFF800000 : f32
    %23 = vector.broadcast %cst_16 : f32 to vector<8x64xf32>
    %24 = vector.extract_strided_slice %18 {offsets = [8, 0], sizes = [8, 64], strides = [1, 1]} : vector<64x64xf32> to vector<8x64xf32>
    %25 = arith.maximumf %22, %24 : vector<8x64xf32>
    %26 = arith.minimumf %22, %24 : vector<8x64xf32>
    %27 = arith.maximumf %23, %26 : vector<8x64xf32>
    %28 = arith.minimumf %23, %26 : vector<8x64xf32>
    %29 = arith.maximumf %23, %28 : vector<8x64xf32>
    %30 = vector.extract_strided_slice %18 {offsets = [16, 0], sizes = [8, 64], strides = [1, 1]} : vector<64x64xf32> to vector<8x64xf32>
    %31 = arith.maximumf %25, %30 : vector<8x64xf32>
    %32 = arith.minimumf %25, %30 : vector<8x64xf32>
    %33 = arith.maximumf %27, %32 : vector<8x64xf32>
    %34 = arith.minimumf %27, %32 : vector<8x64xf32>
    %35 = arith.maximumf %29, %34 : vector<8x64xf32>
    %36 = vector.extract_strided_slice %18 {offsets = [24, 0], sizes = [8, 64], strides = [1, 1]} : vector<64x64xf32> to vector<8x64xf32>
    %37 = arith.maximumf %31, %36 : vector<8x64xf32>
    %38 = arith.minimumf %31, %36 : vector<8x64xf32>
    %39 = arith.maximumf %33, %38 : vector<8x64xf32>
    %40 = arith.minimumf %33, %38 : vector<8x64xf32>
    %41 = arith.maximumf %35, %40 : vector<8x64xf32>
    %42 = vector.extract_strided_slice %18 {offsets = [32, 0], sizes = [8, 64], strides = [1, 1]} : vector<64x64xf32> to vector<8x64xf32>
    %43 = arith.maximumf %37, %42 : vector<8x64xf32>
    %44 = arith.minimumf %37, %42 : vector<8x64xf32>
    %45 = arith.maximumf %39, %44 : vector<8x64xf32>
    %46 = arith.minimumf %39, %44 : vector<8x64xf32>
    %47 = arith.maximumf %41, %46 : vector<8x64xf32>
    %48 = vector.extract_strided_slice %18 {offsets = [40, 0], sizes = [8, 64], strides = [1, 1]} : vector<64x64xf32> to vector<8x64xf32>
    %49 = arith.maximumf %43, %48 : vector<8x64xf32>
    %50 = arith.minimumf %43, %48 : vector<8x64xf32>
    %51 = arith.maximumf %45, %50 : vector<8x64xf32>
    %52 = arith.minimumf %45, %50 : vector<8x64xf32>
    %53 = arith.maximumf %47, %52 : vector<8x64xf32>
    %54 = vector.extract_strided_slice %18 {offsets = [48, 0], sizes = [8, 64], strides = [1, 1]} : vector<64x64xf32> to vector<8x64xf32>
    %55 = arith.maximumf %49, %54 : vector<8x64xf32>
    %56 = arith.minimumf %49, %54 : vector<8x64xf32>
    %57 = arith.maximumf %51, %56 : vector<8x64xf32>
    %58 = arith.minimumf %51, %56 : vector<8x64xf32>
    %59 = arith.maximumf %53, %58 : vector<8x64xf32>
    %60 = vector.extract_strided_slice %18 {offsets = [56, 0], sizes = [8, 64], strides = [1, 1]} : vector<64x64xf32> to vector<8x64xf32>
    %61 = arith.maximumf %55, %60 : vector<8x64xf32>
    %62 = arith.minimumf %55, %60 : vector<8x64xf32>
    %63 = arith.maximumf %57, %62 : vector<8x64xf32>
    %64 = arith.minimumf %57, %62 : vector<8x64xf32>
    %65 = arith.maximumf %59, %64 : vector<8x64xf32>
    %66 = tpu.concatenate %61, %63, %65 in 0 : vector<8x64xf32>, vector<8x64xf32>, vector<8x64xf32> -> vector<24x64xf32>
    %67 = tpu.iota {dimensions = array<i32: 0>} : vector<24x64xi32>
    %68 = tpu.iota {dimensions = array<i32: 1>} : vector<24x64xi32>
    %c64_i32 = arith.constant 64 : i32
    %69 = vector.broadcast %c64_i32 : i32 to vector<24x64xi32>
    %70 = arith.muli %67, %69 : vector<24x64xi32>
    %71 = arith.addi %70, %68 : vector<24x64xi32>
    %72 = vector.shape_cast %66 : vector<24x64xf32> to vector<1x24x64xf32>
    %cst_17 = arith.constant dense<0xFF800000> : vector<1xf32>
    %73 = vector.multi_reduction <maximumf>, %72, %cst_17 [1, 2] : vector<1x24x64xf32> to vector<1xf32>
    %74 = vector.shape_cast %73 : vector<1xf32> to vector<1x1x1xf32>
    %75 = vector.extract %74[0, 0, 0] : f32 from vector<1x1x1xf32>
    %76 = vector.broadcast %75 : f32 to vector<24x64xf32>
    %77 = arith.cmpf oeq, %66, %76 : vector<24x64xf32>
    %c1536_i32 = arith.constant 1536 : i32
    %78 = vector.broadcast %c1536_i32 : i32 to vector<24x64xi32>
    %79 = arith.select %77, %71, %78 : vector<24x64xi1>, vector<24x64xi32>
    %80 = vector.shape_cast %79 : vector<24x64xi32> to vector<1x24x64xi32>
    %cst_18 = arith.constant dense<2147483647> : vector<1xi32>
    %81 = vector.multi_reduction <minsi>, %80, %cst_18 [1, 2] : vector<1x24x64xi32> to vector<1xi32>
    %82 = vector.shape_cast %81 : vector<1xi32> to vector<1x1x1xi32>
    %83 = vector.extract %82[0, 0, 0] : i32 from vector<1x1x1xi32>
    %84 = vector.broadcast %83 : i32 to vector<24x64xi32>
    %85 = arith.cmpi eq, %71, %84 : vector<24x64xi32>
    %cst_19 = arith.constant 0xFF800000 : f32
    %86 = vector.broadcast %cst_19 : f32 to vector<24x64xf32>
    %87 = arith.select %85, %86, %66 : vector<24x64xi1>, vector<24x64xf32>
    %cst_20 = arith.constant 0.000000e+00 : f32
    %88 = arith.addf %cst_20, %75 : f32
    %89 = vector.shape_cast %87 : vector<24x64xf32> to vector<1x24x64xf32>
    %cst_21 = arith.constant dense<0xFF800000> : vector<1xf32>
    %90 = vector.multi_reduction <maximumf>, %89, %cst_21 [1, 2] : vector<1x24x64xf32> to vector<1xf32>
    %91 = vector.shape_cast %90 : vector<1xf32> to vector<1x1x1xf32>
    %92 = vector.extract %91[0, 0, 0] : f32 from vector<1x1x1xf32>
    %93 = vector.broadcast %92 : f32 to vector<24x64xf32>
    %94 = arith.cmpf oeq, %87, %93 : vector<24x64xf32>
    %c1536_i32_22 = arith.constant 1536 : i32
    %95 = vector.broadcast %c1536_i32_22 : i32 to vector<24x64xi32>
    %96 = arith.select %94, %71, %95 : vector<24x64xi1>, vector<24x64xi32>
    %97 = vector.shape_cast %96 : vector<24x64xi32> to vector<1x24x64xi32>
    %cst_23 = arith.constant dense<2147483647> : vector<1xi32>
    %98 = vector.multi_reduction <minsi>, %97, %cst_23 [1, 2] : vector<1x24x64xi32> to vector<1xi32>
    %99 = vector.shape_cast %98 : vector<1xi32> to vector<1x1x1xi32>
    %100 = vector.extract %99[0, 0, 0] : i32 from vector<1x1x1xi32>
    %101 = vector.broadcast %100 : i32 to vector<24x64xi32>
    %102 = arith.cmpi eq, %71, %101 : vector<24x64xi32>
    %cst_24 = arith.constant 0xFF800000 : f32
    %103 = vector.broadcast %cst_24 : f32 to vector<24x64xf32>
    %104 = arith.select %102, %103, %87 : vector<24x64xi1>, vector<24x64xf32>
    %105 = arith.addf %88, %92 : f32
    %106 = vector.shape_cast %104 : vector<24x64xf32> to vector<1x24x64xf32>
    %cst_25 = arith.constant dense<0xFF800000> : vector<1xf32>
    %107 = vector.multi_reduction <maximumf>, %106, %cst_25 [1, 2] : vector<1x24x64xf32> to vector<1xf32>
    %108 = vector.shape_cast %107 : vector<1xf32> to vector<1x1x1xf32>
    %109 = vector.extract %108[0, 0, 0] : f32 from vector<1x1x1xf32>
    %110 = arith.addf %105, %109 : f32
    %cst_26 = arith.constant 0.333333343 : f32
    %111 = arith.mulf %110, %cst_26 : f32
    %112 = vector.broadcast %111 : f32 to vector<1x1xf32>
    %c0_27 = arith.constant 0 : index
    %c0_28 = arith.constant 0 : index
    %c0_29 = arith.constant 0 : index
    %113 = vector.load %arg10[%c0_27, %c0_28, %c0_29] : memref<2x1x1xf32, #tpu.memory_space<vmem>>, vector<1x1x1xf32>
    %114 = vector.shape_cast %113 : vector<1x1x1xf32> to vector<1x1xf32>
    %115 = vector.shape_cast %112 : vector<1x1xf32> to vector<1x1x1xf32>
    tpu.vector_store %arg10[%c0_27, %c0_28, %c0_29], %115 {strides = array<i32>} : memref<2x1x1xf32, #tpu.memory_space<vmem>>, vector<1x1x1xf32>,
    %cst_30 = arith.constant dense<0.000000e+00> : vector<1x32xf32>
    %116 = tpu.matmul %3, %5, %cst_30 {dimension_numbers = #tpu.dot_dimension_numbers<[1], [1], [0], [0], [0, 0, 1, 0], [], []>} : vector<1x16xbf16>, vector<32x16xbf16>, vector<1x32xf32> -> vector<1x32xf32>
    %cst_31 = arith.constant 6.250000e-02 : f32
    %117 = vector.broadcast %cst_31 : f32 to vector<1x32xf32>
    %118 = arith.mulf %116, %117 : vector<1x32xf32>
    %c1 = arith.constant 1 : index
    %c0_32 = arith.constant 0 : index
    %c0_33 = arith.constant 0 : index
    %119 = vector.load %arg1[%c1, %c0_32, %c0_33] : memref<2x32x16xbf16, #tpu.memory_space<vmem>>, vector<1x32x16xbf16>
    %120 = vector.shape_cast %119 : vector<1x32x16xbf16> to vector<32x16xbf16>
    %cst_34 = arith.constant dense<0.000000e+00> : vector<1x16xf32>
    %121 = tpu.matmul %2, %120, %cst_34 {dimension_numbers = #tpu.dot_dimension_numbers<[1], [0], [0], [1], [0, 0, 1, 1], [], []>} : vector<1x32xbf16>, vector<32x16xbf16>, vector<1x16xf32> -> vector<1x16xf32>
    %122 = vector.extract_strided_slice %121 {offsets = [0, 0], sizes = [1, 4], strides = [1, 1]} : vector<1x16xf32> to vector<1x4xf32>
    %123 = vector.extract_strided_slice %121 {offsets = [0, 4], sizes = [1, 4], strides = [1, 1]} : vector<1x16xf32> to vector<1x4xf32>
    %124 = vector.extract_strided_slice %121 {offsets = [0, 8], sizes = [1, 4], strides = [1, 1]} : vector<1x16xf32> to vector<1x4xf32>
    %125 = vector.extract_strided_slice %121 {offsets = [0, 12], sizes = [1, 4], strides = [1, 1]} : vector<1x16xf32> to vector<1x4xf32>
    %126 = tpu.concatenate %122, %123, %124, %125 in 0 : vector<1x4xf32>, vector<1x4xf32>, vector<1x4xf32>, vector<1x4xf32> -> vector<4x4xf32>
    %cst_35 = arith.constant dense<0.000000e+00> : vector<64x4xf32>
    %127 = tpu.matmul %0, %126, %cst_35 {dimension_numbers = #tpu.dot_dimension_numbers<[1], [0], [0], [1], [0, 0, 1, 1], [], []>} : vector<64x4xf32>, vector<4x4xf32>, vector<64x4xf32> -> vector<64x4xf32>
    %cst_36 = arith.constant dense<0.000000e+00> : vector<64x64xf32>
    %128 = tpu.matmul %127, %1, %cst_36 {dimension_numbers = #tpu.dot_dimension_numbers<[1], [0], [0], [1], [0, 0, 1, 1], [], []>} : vector<64x4xf32>, vector<4x64xf32>, vector<64x64xf32> -> vector<64x64xf32>
    %129 = arith.negf %128 : vector<64x64xf32>
    %130 = math.exp %129 : vector<64x64xf32>
    %cst_37 = arith.constant 1.000000e+00 : f32
    %131 = vector.broadcast %cst_37 : f32 to vector<64x64xf32>
    %132 = arith.addf %131, %130 : vector<64x64xf32>
    %133 = arith.divf %131, %132 : vector<64x64xf32>
    %c1_38 = arith.constant 1 : index
    %c0_39 = arith.constant 0 : index
    %c0_40 = arith.constant 0 : index
    %c0_41 = arith.constant 0 : index
    %134 = vector.load %arg9[%c1_38, %c0_39, %c0_40, %c0_41] : memref<2x1x64x64xf32, #tpu.memory_space<vmem>>, vector<1x1x64x64xf32>
    %135 = vector.shape_cast %134 : vector<1x1x64x64xf32> to vector<64x64xf32>
    %136 = vector.shape_cast %133 : vector<64x64xf32> to vector<1x1x64x64xf32>
    tpu.vector_store %arg9[%c1_38, %c0_39, %c0_40, %c0_41], %136 {strides = array<i32>} : memref<2x1x64x64xf32, #tpu.memory_space<vmem>>, vector<1x1x64x64xf32>,
    %137 = vector.extract_strided_slice %133 {offsets = [0, 0], sizes = [8, 64], strides = [1, 1]} : vector<64x64xf32> to vector<8x64xf32>
    %cst_42 = arith.constant 0xFF800000 : f32
    %138 = vector.broadcast %cst_42 : f32 to vector<8x64xf32>
    %139 = vector.extract_strided_slice %133 {offsets = [8, 0], sizes = [8, 64], strides = [1, 1]} : vector<64x64xf32> to vector<8x64xf32>
    %140 = arith.maximumf %137, %139 : vector<8x64xf32>
    %141 = arith.minimumf %137, %139 : vector<8x64xf32>
    %142 = arith.maximumf %138, %141 : vector<8x64xf32>
    %143 = arith.minimumf %138, %141 : vector<8x64xf32>
    %144 = arith.maximumf %138, %143 : vector<8x64xf32>
    %145 = vector.extract_strided_slice %133 {offsets = [16, 0], sizes = [8, 64], strides = [1, 1]} : vector<64x64xf32> to vector<8x64xf32>
    %146 = arith.maximumf %140, %145 : vector<8x64xf32>
    %147 = arith.minimumf %140, %145 : vector<8x64xf32>
    %148 = arith.maximumf %142, %147 : vector<8x64xf32>
    %149 = arith.minimumf %142, %147 : vector<8x64xf32>
    %150 = arith.maximumf %144, %149 : vector<8x64xf32>
    %151 = vector.extract_strided_slice %133 {offsets = [24, 0], sizes = [8, 64], strides = [1, 1]} : vector<64x64xf32> to vector<8x64xf32>
    %152 = arith.maximumf %146, %151 : vector<8x64xf32>
    %153 = arith.minimumf %146, %151 : vector<8x64xf32>
    %154 = arith.maximumf %148, %153 : vector<8x64xf32>
    %155 = arith.minimumf %148, %153 : vector<8x64xf32>
    %156 = arith.maximumf %150, %155 : vector<8x64xf32>
    %157 = vector.extract_strided_slice %133 {offsets = [32, 0], sizes = [8, 64], strides = [1, 1]} : vector<64x64xf32> to vector<8x64xf32>
    %158 = arith.maximumf %152, %157 : vector<8x64xf32>
    %159 = arith.minimumf %152, %157 : vector<8x64xf32>
    %160 = arith.maximumf %154, %159 : vector<8x64xf32>
    %161 = arith.minimumf %154, %159 : vector<8x64xf32>
    %162 = arith.maximumf %156, %161 : vector<8x64xf32>
    %163 = vector.extract_strided_slice %133 {offsets = [40, 0], sizes = [8, 64], strides = [1, 1]} : vector<64x64xf32> to vector<8x64xf32>
    %164 = arith.maximumf %158, %163 : vector<8x64xf32>
    %165 = arith.minimumf %158, %163 : vector<8x64xf32>
    %166 = arith.maximumf %160, %165 : vector<8x64xf32>
    %167 = arith.minimumf %160, %165 : vector<8x64xf32>
    %168 = arith.maximumf %162, %167 : vector<8x64xf32>
    %169 = vector.extract_strided_slice %133 {offsets = [48, 0], sizes = [8, 64], strides = [1, 1]} : vector<64x64xf32> to vector<8x64xf32>
    %170 = arith.maximumf %164, %169 : vector<8x64xf32>
    %171 = arith.minimumf %164, %169 : vector<8x64xf32>
    %172 = arith.maximumf %166, %171 : vector<8x64xf32>
    %173 = arith.minimumf %166, %171 : vector<8x64xf32>
    %174 = arith.maximumf %168, %173 : vector<8x64xf32>
    %175 = vector.extract_strided_slice %133 {offsets = [56, 0], sizes = [8, 64], strides = [1, 1]} : vector<64x64xf32> to vector<8x64xf32>
    %176 = arith.maximumf %170, %175 : vector<8x64xf32>
    %177 = arith.minimumf %170, %175 : vector<8x64xf32>
    %178 = arith.maximumf %172, %177 : vector<8x64xf32>
    %179 = arith.minimumf %172, %177 : vector<8x64xf32>
    %180 = arith.maximumf %174, %179 : vector<8x64xf32>
    %181 = tpu.concatenate %176, %178, %180 in 0 : vector<8x64xf32>, vector<8x64xf32>, vector<8x64xf32> -> vector<24x64xf32>
    %182 = tpu.iota {dimensions = array<i32: 0>} : vector<24x64xi32>
    %183 = tpu.iota {dimensions = array<i32: 1>} : vector<24x64xi32>
    %c64_i32_43 = arith.constant 64 : i32
    %184 = vector.broadcast %c64_i32_43 : i32 to vector<24x64xi32>
    %185 = arith.muli %182, %184 : vector<24x64xi32>
    %186 = arith.addi %185, %183 : vector<24x64xi32>
    %187 = vector.shape_cast %181 : vector<24x64xf32> to vector<1x24x64xf32>
    %cst_44 = arith.constant dense<0xFF800000> : vector<1xf32>
    %188 = vector.multi_reduction <maximumf>, %187, %cst_44 [1, 2] : vector<1x24x64xf32> to vector<1xf32>
    %189 = vector.shape_cast %188 : vector<1xf32> to vector<1x1x1xf32>
    %190 = vector.extract %189[0, 0, 0] : f32 from vector<1x1x1xf32>
    %191 = vector.broadcast %190 : f32 to vector<24x64xf32>
    %192 = arith.cmpf oeq, %181, %191 : vector<24x64xf32>
    %c1536_i32_45 = arith.constant 1536 : i32
    %193 = vector.broadcast %c1536_i32_45 : i32 to vector<24x64xi32>
    %194 = arith.select %192, %186, %193 : vector<24x64xi1>, vector<24x64xi32>
    %195 = vector.shape_cast %194 : vector<24x64xi32> to vector<1x24x64xi32>
    %cst_46 = arith.constant dense<2147483647> : vector<1xi32>
    %196 = vector.multi_reduction <minsi>, %195, %cst_46 [1, 2] : vector<1x24x64xi32> to vector<1xi32>
    %197 = vector.shape_cast %196 : vector<1xi32> to vector<1x1x1xi32>
    %198 = vector.extract %197[0, 0, 0] : i32 from vector<1x1x1xi32>
    %199 = vector.broadcast %198 : i32 to vector<24x64xi32>
    %200 = arith.cmpi eq, %186, %199 : vector<24x64xi32>
    %cst_47 = arith.constant 0xFF800000 : f32
    %201 = vector.broadcast %cst_47 : f32 to vector<24x64xf32>
    %202 = arith.select %200, %201, %181 : vector<24x64xi1>, vector<24x64xf32>
    %cst_48 = arith.constant 0.000000e+00 : f32
    %203 = arith.addf %cst_48, %190 : f32
    %204 = vector.shape_cast %202 : vector<24x64xf32> to vector<1x24x64xf32>
    %cst_49 = arith.constant dense<0xFF800000> : vector<1xf32>
    %205 = vector.multi_reduction <maximumf>, %204, %cst_49 [1, 2] : vector<1x24x64xf32> to vector<1xf32>
    %206 = vector.shape_cast %205 : vector<1xf32> to vector<1x1x1xf32>
    %207 = vector.extract %206[0, 0, 0] : f32 from vector<1x1x1xf32>
    %208 = vector.broadcast %207 : f32 to vector<24x64xf32>
    %209 = arith.cmpf oeq, %202, %208 : vector<24x64xf32>
    %c1536_i32_50 = arith.constant 1536 : i32
    %210 = vector.broadcast %c1536_i32_50 : i32 to vector<24x64xi32>
    %211 = arith.select %209, %186, %210 : vector<24x64xi1>, vector<24x64xi32>
    %212 = vector.shape_cast %211 : vector<24x64xi32> to vector<1x24x64xi32>
    %cst_51 = arith.constant dense<2147483647> : vector<1xi32>
    %213 = vector.multi_reduction <minsi>, %212, %cst_51 [1, 2] : vector<1x24x64xi32> to vector<1xi32>
    %214 = vector.shape_cast %213 : vector<1xi32> to vector<1x1x1xi32>
    %215 = vector.extract %214[0, 0, 0] : i32 from vector<1x1x1xi32>
    %216 = vector.broadcast %215 : i32 to vector<24x64xi32>
    %217 = arith.cmpi eq, %186, %216 : vector<24x64xi32>
    %cst_52 = arith.constant 0xFF800000 : f32
    %218 = vector.broadcast %cst_52 : f32 to vector<24x64xf32>
    %219 = arith.select %217, %218, %202 : vector<24x64xi1>, vector<24x64xf32>
    %220 = arith.addf %203, %207 : f32
    %221 = vector.shape_cast %219 : vector<24x64xf32> to vector<1x24x64xf32>
    %cst_53 = arith.constant dense<0xFF800000> : vector<1xf32>
    %222 = vector.multi_reduction <maximumf>, %221, %cst_53 [1, 2] : vector<1x24x64xf32> to vector<1xf32>
    %223 = vector.shape_cast %222 : vector<1xf32> to vector<1x1x1xf32>
    %224 = vector.extract %223[0, 0, 0] : f32 from vector<1x1x1xf32>
    %225 = arith.addf %220, %224 : f32
    %cst_54 = arith.constant 0.333333343 : f32
    %226 = arith.mulf %225, %cst_54 : f32
    %227 = vector.broadcast %226 : f32 to vector<1x1xf32>
    %c1_55 = arith.constant 1 : index
    %c0_56 = arith.constant 0 : index
    %c0_57 = arith.constant 0 : index
    %228 = vector.load %arg10[%c1_55, %c0_56, %c0_57] : memref<2x1x1xf32, #tpu.memory_space<vmem>>, vector<1x1x1xf32>
    %229 = vector.shape_cast %228 : vector<1x1x1xf32> to vector<1x1xf32>
    %230 = vector.shape_cast %227 : vector<1x1xf32> to vector<1x1x1xf32>
    tpu.vector_store %arg10[%c1_55, %c0_56, %c0_57], %230 {strides = array<i32>} : memref<2x1x1xf32, #tpu.memory_space<vmem>>, vector<1x1x1xf32>,
    %cst_58 = arith.constant dense<0.000000e+00> : vector<1x32xf32>
    %231 = tpu.matmul %3, %120, %cst_58 {dimension_numbers = #tpu.dot_dimension_numbers<[1], [1], [0], [0], [0, 0, 1, 0], [], []>} : vector<1x16xbf16>, vector<32x16xbf16>, vector<1x32xf32> -> vector<1x32xf32>
    %cst_59 = arith.constant 6.250000e-02 : f32
    %232 = vector.broadcast %cst_59 : f32 to vector<1x32xf32>
    %233 = arith.mulf %231, %232 : vector<1x32xf32>
    %234 = tpu.concatenate %118, %233 in 0 : vector<1x32xf32>, vector<1x32xf32> -> vector<2x32xf32>
    %235 = arith.truncf %234 : vector<2x32xf32> to vector<2x32xbf16>
    %c0_60 = arith.constant 0 : index
    %c0_61 = arith.constant 0 : index
    %236 = vector.load %arg5[%c0_60, %c0_61] : memref<32x64xbf16, #tpu.memory_space<vmem>>, vector<32x64xbf16>
    %cst_62 = arith.constant dense<0.000000e+00> : vector<2x64xf32>
    %237 = tpu.matmul %235, %236, %cst_62 {dimension_numbers = #tpu.dot_dimension_numbers<[1], [0], [0], [1], [0, 0, 1, 1], [], []>} : vector<2x32xbf16>, vector<32x64xbf16>, vector<2x64xf32> -> vector<2x64xf32>
    %c0_63 = arith.constant 0 : index
    %c0_64 = arith.constant 0 : index
    %238 = vector.load %arg6[%c0_63, %c0_64] : memref<1x64xf32, #tpu.memory_space<vmem>>, vector<1x64xf32>
    %239 = vector.broadcast %238 : vector<1x64xf32> to vector<2x64xf32>
    %240 = arith.addf %237, %239 : vector<2x64xf32>
    %cst_65 = arith.constant 0.000000e+00 : f32
    %241 = vector.broadcast %cst_65 : f32 to vector<2x64xf32>
    %242 = arith.maximumf %240, %241 : vector<2x64xf32>
    %243 = arith.truncf %242 : vector<2x64xf32> to vector<2x64xbf16>
    %c0_66 = arith.constant 0 : index
    %c0_67 = arith.constant 0 : index
    %244 = vector.load %arg7[%c0_66, %c0_67] : memref<64x16xbf16, #tpu.memory_space<vmem>>, vector<64x16xbf16>
    %cst_68 = arith.constant dense<0.000000e+00> : vector<2x16xf32>
    %245 = tpu.matmul %243, %244, %cst_68 {dimension_numbers = #tpu.dot_dimension_numbers<[1], [0], [0], [1], [0, 0, 1, 1], [], []>} : vector<2x64xbf16>, vector<64x16xbf16>, vector<2x16xf32> -> vector<2x16xf32>
    %c0_69 = arith.constant 0 : index
    %c0_70 = arith.constant 0 : index
    %246 = vector.load %arg8[%c0_69, %c0_70] : memref<1x16xf32, #tpu.memory_space<vmem>>, vector<1x16xf32>
    %247 = vector.broadcast %246 : vector<1x16xf32> to vector<2x16xf32>
    %248 = arith.addf %245, %247 : vector<2x16xf32>
    %249 = arith.mulf %248, %248 : vector<2x16xf32>
    %cst_71 = arith.constant dense<0.000000e+00> : vector<2xf32>
    %250 = vector.multi_reduction <add>, %249, %cst_71 [1] : vector<2x16xf32> to vector<2xf32>
    %251 = vector.shape_cast %250 : vector<2xf32> to vector<2x1xf32>
    %cst_72 = arith.constant 1.000000e-24 : f32
    %252 = vector.broadcast %cst_72 : f32 to vector<2x1xf32>
    %253 = arith.maximumf %251, %252 : vector<2x1xf32>
    %254 = math.rsqrt %253 : vector<2x1xf32>
    %255 = vector.broadcast %254 : vector<2x1xf32> to vector<2x16xf32>
    %256 = arith.mulf %248, %255 : vector<2x16xf32>
    %257 = vector.shape_cast %256 : vector<2x16xf32> to vector<2x1x16xf32>
    %c0_73 = arith.constant 0 : index
    %c0_74 = arith.constant 0 : index
    %c0_75 = arith.constant 0 : index
    %258 = vector.load %arg11[%c0_73, %c0_74, %c0_75] : memref<2x1x16xf32, #tpu.memory_space<vmem>>, vector<2x1x16xf32>
    tpu.vector_store %arg11[%c0_73, %c0_74, %c0_75], %257 {strides = array<i32>} : memref<2x1x16xf32, #tpu.memory_space<vmem>>, vector<2x1x16xf32>,
    return
  }
  func.func @transform_0(%arg0: i32) -> (i32, i32, i32) {
    %c0_i32 = arith.constant 0 : i32
    %c0_i32_0 = arith.constant 0 : i32
    %c0_i32_1 = arith.constant 0 : i32
    return %arg0, %c0_i32, %c0_i32_0 : i32, i32, i32
  }
  func.func @transform_1(%arg0: i32) -> (i32, i32) {
    %c0_i32 = arith.constant 0 : i32
    %c0_i32_0 = arith.constant 0 : i32
    %c0_i32_1 = arith.constant 0 : i32
    return %c0_i32, %c0_i32_0 : i32, i32
  }
  func.func @transform_2(%arg0: i32) -> (i32, i32) {
    %c0_i32 = arith.constant 0 : i32
    %c0_i32_0 = arith.constant 0 : i32
    %c0_i32_1 = arith.constant 0 : i32
    return %c0_i32, %c0_i32_0 : i32, i32
  }
  func.func @transform_3(%arg0: i32) -> (i32, i32) {
    %c0_i32 = arith.constant 0 : i32
    %c0_i32_0 = arith.constant 0 : i32
    %c0_i32_1 = arith.constant 0 : i32
    return %c0_i32, %c0_i32_0 : i32, i32
  }
  func.func @transform_4(%arg0: i32) -> (i32, i32) {
    %c0_i32 = arith.constant 0 : i32
    %c0_i32_0 = arith.constant 0 : i32
    %c0_i32_1 = arith.constant 0 : i32
    return %c0_i32, %c0_i32_0 : i32, i32
  }
  func.func @transform_5(%arg0: i32) -> (i32, i32) {
    %c0_i32 = arith.constant 0 : i32
    %c0_i32_0 = arith.constant 0 : i32
    %c0_i32_1 = arith.constant 0 : i32
    return %c0_i32, %c0_i32_0 : i32, i32
  }
  func.func @transform_6(%arg0: i32) -> (i32, i32) {
    %c0_i32 = arith.constant 0 : i32
    %c0_i32_0 = arith.constant 0 : i32
    %c0_i32_1 = arith.constant 0 : i32
    return %c0_i32, %c0_i32_0 : i32, i32
  }
  func.func @transform_7(%arg0: i32) -> (i32, i32) {
    %c0_i32 = arith.constant 0 : i32
    %c0_i32_0 = arith.constant 0 : i32
    %c0_i32_1 = arith.constant 0 : i32
    return %c0_i32, %c0_i32_0 : i32, i32
  }
  func.func @transform_8(%arg0: i32) -> (i32, i32, i32, i32) {
    %c0_i32 = arith.constant 0 : i32
    %c0_i32_0 = arith.constant 0 : i32
    %c0_i32_1 = arith.constant 0 : i32
    %c0_i32_2 = arith.constant 0 : i32
    return %arg0, %c0_i32, %c0_i32_0, %c0_i32_1 : i32, i32, i32, i32
  }
  func.func @transform_9(%arg0: i32) -> (i32, i32, i32) {
    %c0_i32 = arith.constant 0 : i32
    %c0_i32_0 = arith.constant 0 : i32
    %c0_i32_1 = arith.constant 0 : i32
    return %arg0, %c0_i32, %c0_i32_0 : i32, i32, i32
  }
  func.func @transform_10(%arg0: i32) -> (i32, i32, i32) {
    %c0_i32 = arith.constant 0 : i32
    %c0_i32_0 = arith.constant 0 : i32
    %c0_i32_1 = arith.constant 0 : i32
    return %arg0, %c0_i32, %c0_i32_0 : i32, i32, i32
  }
}

</mosaic_0001>

<bundles_post_ra>
// kernel: embedding_model_forward.1
= control target key start
LH: loop header
LB: loop body
LE: loop exit
PB: predicated region body
PF: predicated region fallthrough
CT: control target
= control target key end

     0   :  { %s3023_s0 = inlined_call_operand.vmem [shape: bf16[4,32,16], index: 0, kind: input, shape index: {}]   ;;  %s3024_s1 = inlined_call_operand.vmem [shape: f32[64,4], index: 1, kind: input, shape index: {}]   ;;  %s3025_s2 = inlined_call_operand.vmem [shape: f32[4,64], index: 2, kind: input, shape index: {}]   ;;  %s3026_s3 = inlined_call_operand.vmem [shape: bf16[1,32], index: 3, kind: input, shape index: {}]   ;;  %s3027_s4 = inlined_call_operand.vmem [shape: bf16[32,64], index: 4, kind: input, shape index: {}]   ;;  %s3028_s5 = inlined_call_operand.vmem [shape: f32[1,64], index: 5, kind: input, shape index: {}]   ;;  %s3029_s6 = inlined_call_operand.vmem [shape: bf16[64,16], index: 6, kind: input, shape index: {}]   ;;  %s3030_s7 = inlined_call_operand.vmem [shape: f32[1,16], index: 7, kind: input, shape index: {}]   ;;  %s3031_s8 = inlined_call_operand.vmem [shape: f32[4,1,64,64], index: 8, kind: output, shape index: {0}]   ;;  %s3032_s9 = inlined_call_operand.vmem [shape: f32[4,1,1], index: 9, kind: output, shape index: {1}]   ;;  %s3033_s10 = inlined_call_operand.hbm [shape: f32[4,1,16], index: 10, kind: output, shape index: {2}]  }
   0x1   :  { %3035 = sst [smem:[#allocation5_spill]] %s3023_s0 }
   0x2   :  { %3036 = sst [smem:[#allocation6_spill]] %s3024_s1 }
   0x3   :  { %16 = vsyncpa [#allocation3], 0 }
   0x4   :  { %18 = vsyncpa [#allocation3 + $0x1], 0  ;;  %s2497_s13 = smov 0   ;;  %s2499_s14 = smov 0  }
   0x5   :  { %s2501_s15 = smov 0   ;;  %s2503_s16 = smov 0  }
   0x6 LB: > { %s2518_s17 = sadd.s32 4294967295, %s2430_s16   ;;  %s1957_s18 = sadd.s32 4294967294, %s2430_s16   ;;  %s2430_s16 = sphi %s2503_s16, %s3045_s16   ;;  %s2426_s15 = sphi %s2501_s15, %s3044_s15   ;;  %s2422_s14 = sphi %s2499_s14, %s3043_s14   ;;  %s2418_s13 = sphi %s2497_s13, %s3042_s13  }
   0x7   : > { %s2522_s19 = sadd.s32 1, %s2430_s16   ;;  %s256_s20 = sadd.s32 1, %s2426_s15 }
   0x8   : > { %s253_s21 = ssub.s32 %s2430_s16, %s2522_s19  ;;  %p266_p0 = scmp.ne.s32.totalorder %s2426_s15, %s2422_s14 }
   0x9   : > { %p254_p1 = scmp.eq.s32.totalorder %s253_s21, 0  ;;  %p267_p2 = scmp.eq.s32.totalorder %s2518_s17, 1 }
   0xa   : > { %p272_p3 = scmp.ne.s32.totalorder %s2422_s14, %s2418_s13  ;;  %p273_p4 = scmp.eq.s32.totalorder %s1957_s18, 1 }
   0xb   : > { %s2533_s22 = scalar_select %p254_p1, %s2426_s15, %s256_s20  }
   0xc   : > { %p2535_p5 = por %p267_p2, %p266_p0  ;;  %p2539_p6 = por %p273_p4, %p272_p3 }
   0xd   : > { %p1960_p7 = scmp.ge.s32.totalorder %s2430_s16, 1  ;;  %p322_p8 = scmp.lt.s32.totalorder %s2430_s16, 3 }
   0xf   : > { %p323_p9 = pnand %p1960_p7, %p322_p8 }
  0x10   : > { %s1962_s25 = sshll.u32 (!%p323_p9), %s2518_s17, 1  ;;  %v2432_v0 = vmov (!%p323_p9), 0.0   ;;  %vm2433_vm0 = vmmov (!%p323_p9), 0   ;;  %s3039_s0 = sld [smem:[#allocation5_spill]] (!%p323_p9)  ;;  %v2569_v3 = vld [vmem:[%s3026_s3] sm:$0x1] (!%p323_p9) }
  0x11   : > { %326 = sbr.rel (%p323_p9) target bundleno = 3365 (0xd25), region = 52  ;;  %2116 = vmatprep.subr.bf16.mxu0 (!%p323_p9), %v2432_v0  ;;  %p372_p10 = scmp.lt.s32.totalorder (!%p323_p9), %s1962_s25, 3  ;;  %2120 = vmatprep.mubr.msk.bf16.mxu0 (!%p323_p9), %vm2433_vm0, %v2432_v0  ;;  %vm419_vm1 = vcmask (!%p323_p9), 261120   ;;  %vm482_vm2 = vcmask (!%p323_p9), 31744   ;;  %vm507_vm3 = vcmask (!%p323_p9), 1043456   ;;  %vm476_vm4 = vcmask (!%p323_p9), 1040384  }
  0x12   : > { %s3040_s1 = sld [smem:[#allocation6_spill]] (!%p323_p9)  ;;  %s2434_s20 = smov (!%p323_p9), 116   ;;  %v401_v12 = vld [vmem:[%s3025_s2] sm:$0xf] (!%p323_p9)  ;;  %vm478_vm5 = vcmask (!%p323_p9), 1041408   ;;  %vm480_vm6 = vcmask (!%p323_p9), 1042432  }
  0x13   : > { %s3034_s21 = smov (!%p323_p9), 124   ;;  %vm796_vm7 = vcmask (!%p323_p9), 523264   ;;  %vm989_vm8 = vcmask (!%p323_p9), 130048  }
  0x18   : > { %s3047_s25 = smov (!%p372_p10, %s1962_s25), 3  ;;  %v2576_v4 = vld [vmem:[%s3040_s1] sm:$0xff]  ;;  %v2595_v19 = vld [vmem:[%s3040_s1 + $0x8] sm:$0xff]  ;;  %v2601_v20 = vld [vmem:[%s3040_s1 + $0x10] sm:$0xff] }
  0x19   : > { %s2057_s26 = sshll.u32 %s3047_s25, 4  ;;  %2126 = vmatprep.mubr.msk.f32.mxu1 %vm482_vm2, %v2576_v4  ;;  %v2612_v21 = vld [vmem:[%s3040_s1 + $0x18] sm:$0xff]  ;;  %v2617_v22 = vld [vmem:[%s3040_s1 + $0x20] sm:$0xff]  ;;  %v2626_v23 = vld [vmem:[%s3040_s1 + $0x28] sm:$0xff] }
  0x1a   : > { %s2555_s29 = scalar_lea.vmem %s3039_s0, %s2057_s26  ;;  %s2436_s26 = smov 120   ;;  %v2631_v24 = vld [vmem:[%s3040_s1 + $0x30] sm:$0xff]  ;;  %v2640_v25 = vld [vmem:[%s3040_s1 + $0x38] sm:$0xff] }
  0x1b   : > { %v2558_v1 = vld [vmem:[%s2555_s29] sm:$0xff]   ;;  %v2561_v2 = vld [vmem:[%s2555_s29 + $0x8] sm:$0xff]   ;;  %v2657_v34 = vld [vmem:[%s2555_s29 + $0x10] sm:$0xff]  }
  0x1c   : > { %2117 = vmatpush3.bf16.msra.mxu0 %v2558_v1  ;;  %v2661_v35 = vld [vmem:[%s2555_s29 + $0x18] sm:$0xff]   ;;  %s2058_s29 = sshll.u32 %s3047_s25, 6 }
  0x1d   : > { %2118 = vmatprep.subr.bf16.mxu0 %v2432_v0  ;;  %s2674_s12 = scalar_lea.vmem %s3031_s8, %s2058_s29 }
  0x20   : > { %2119 = vmatpush3.bf16.msra.mxu0 %v2561_v2 }
  0x21   : > { %2138 = vmatprep.subr.msk.mxu0 %vm507_vm3, %v401_v12 }
  0x23   : > { %2121 = vmatmul.mubr.msk.bf16.vlgmr.msra.gmra.mrb[0].mxu0 %vm419_vm1, %v2569_v3 }
  0x24   : > { %2139 = vmatpush3.msk.msra.mxu0 %vm507_vm3, %v401_v12 }
  0x25   : > { %2152 = vmatprep.subr.bf16.mxu0 %v2432_v0 }
  0xf6   : > { %v457_v5 = vpop.f32.mrb[0].mxu0 }
  0xf7   : > { %v2122_v6 = vpop.f32.mrb[1].mxu0  ;;  %v472_v7 = vrot.slane %v457_v5, 5  ;;  %v464_v8 = vrot.slane %v457_v5, 7  ;;  %v468_v11 = vrot.slane %v457_v5, 6 }
  0xf8   : > { %v460_v9 = vpop.f32.mrb[2].mxu0 }
  0xf9   : > { %473 = vrot.lane.b32.xlu1 %v472_v7, %s2434_s20  ;;  %465 = vrot.lane.b32.xlu0 %v464_v8, %s3034_s21  ;;  %v2123_v10 = vpop.f32.mrb[3].mxu0 }
  0xfd   : > { %469 = vrot.lane.b32.xlu0 %v468_v11, %s2436_s26 }
 0x16b   : > { %v466_v13 = vpop.permute.xlu0 %465  ;;  %v474_v16 = vpop.permute.xlu1 %473 }
 0x16c   : > { %v477_v14 = vsel %vm476_vm4, %v457_v5, %v466_v13 }
 0x16f   : > { %v470_v15 = vpop.permute.xlu0 %469 }
 0x170   : > { %v479_v17 = vsel %vm478_vm5, %v477_v14, %v470_v15 }
 0x171   : > { %v481_v18 = vsel %vm480_vm6, %v479_v17, %v474_v16 }
 0x172   : > { %2124 = vmatprep.subr.msk.mxu1 %vm507_vm3, %v481_v18 }
 0x173   : > { %2125 = vmatpush3.msk.msra.mxu1 %vm507_vm3, %v481_v18 }
 0x174   : > { %2127 = vmatmul.mubr.msk.f32.vlgmr.msra.gmra.mrb[0].mxu1 %vm482_vm2, %v2595_v19  ;;  %2160 = vmatprep.subr.bf16.mxu1 %v2432_v0 }
 0x175   : > { %2129 = vmatprep.mubr.msk.f32.mxu1 %vm482_vm2, %v2601_v20  ;;  %2161 = vmatpush3.bf16.msra.mxu1 %v2657_v34 }
 0x176   : > { %2162 = vmatprep.subr.bf16.mxu1 %v2432_v0 }
 0x178   : > { %2130 = vmatmul.mubr.msk.f32.gmra.mrb[2].mxu1 %vm482_vm2, %v2612_v21 }
 0x179   : > { %2132 = vmatprep.mubr.msk.f32.mxu1 %vm482_vm2, %v2617_v22  ;;  %2163 = vmatpush3.bf16.msra.mxu1 %v2661_v35 }
 0x17a   : > { %2182 = vmatprep.subr.msk.mxu1 %vm507_vm3, %v401_v12 }
 0x17c   : > { %2133 = vmatmul.mubr.msk.f32.gmra.mrb[4].mxu1 %vm482_vm2, %v2626_v23 }
 0x17d   : > { %2135 = vmatprep.mubr.msk.f32.mxu1 %vm482_vm2, %v2631_v24 }
 0x180   : > { %2136 = vmatmul.mubr.msk.f32.gmra.mrb[6].mxu1 %vm482_vm2, %v2640_v25 }
 0x181   : > { %2164 = vmatprep.mubr.msk.bf16.mxu1 %vm2433_vm0, %v2432_v0 }
 0x184   : > { %2165 = vmatmul.mubr.msk.bf16.vlgmr.msra.gmra.mrb[8].mxu1 %vm419_vm1, %v2569_v3 }
 0x185   : > { %2183 = vmatpush3.msk.msra.mxu1 %vm507_vm3, %v401_v12 }
 0x186   : > { %2196 = vmatprep.subr.bf16.mxu1 %v2432_v0 }
 0x247   : > { %v2128_v26 = vpop.f32.mrb[0].mxu1 }
 0x248   : > { %v577_v27 = vpop.f32.mrb[1].mxu1 }
 0x249   : > { %2140 = vmatprep.mubr.msk.f32.mxu0 %vm482_vm2, %v577_v27 }
 0x24a   : > { %2141 = vmatmul.mubr.msk.f32.vlgmr.msra.gmra.mrb[4].mxu0 %vm482_vm2, %v2128_v26 }
 0x24b   : > { %v2131_v28 = vpop.f32.mrb[2].mxu1 }
 0x24c   : > { %v587_v29 = vpop.f32.mrb[3].mxu1 }
 0x24d   : > { %2143 = vmatprep.mubr.msk.f32.mxu0 %vm482_vm2, %v587_v29 }
 0x24e   : > { %2144 = vmatmul.mubr.msk.f32.gmra.mrb[6].mxu0 %vm482_vm2, %v2131_v28 }
 0x24f   : > { %v2134_v30 = vpop.f32.mrb[4].mxu1 }
 0x250   : > { %v597_v31 = vpop.f32.mrb[5].mxu1 }
 0x251   : > { %2146 = vmatprep.mubr.msk.f32.mxu0 %vm482_vm2, %v597_v31 }
 0x252   : > { %2147 = vmatmul.mubr.msk.f32.gmra.mrb[8].mxu0 %vm482_vm2, %v2134_v30 }
 0x253   : > { %v2137_v32 = vpop.f32.mrb[6].mxu1 }
 0x254   : > { %v607_v33 = vpop.f32.mrb[7].mxu1 }
 0x255   : > { %2149 = vmatprep.mubr.msk.f32.mxu0 %vm482_vm2, %v607_v33 }
 0x256   : > { %2150 = vmatmul.mubr.msk.f32.gmra.mrb[10].mxu0 %vm482_vm2, %v2137_v32 }
 0x257   : > { %2156 = vmatprep.mubr.msk.bf16.mxu0 %vm2433_vm0, %v2432_v0 }
 0x31d   : > { %v2142_v36 = vpop.f32.mrb[4].mxu0 }
 0x31e   : > { %v1991_v37 = vmul.f32 -1.442695, %v2142_v36  ;;  %v709_v38 = vpop.f32.mrb[5].mxu0 }
 0x31f   : > { %v1990_v39 = vmul.f32 -1.442695, %v709_v38 }
 0x320   : > { %2302 = vpow2.f32 %v1991_v37 }
 0x321   : > { %2304 = vpow2.f32 %v1990_v39  ;;  %v2145_v40 = vpop.f32.mrb[6].mxu0 }
 0x322   : > { %v1993_v41 = vmul.f32 -1.442695, %v2145_v40  ;;  %v719_v42 = vpop.f32.mrb[7].mxu0 }
 0x323   : > { %v1992_v43 = vmul.f32 -1.442695, %v719_v42 }
 0x324   : > { %2306 = vpow2.f32 %v1993_v41 }
 0x325   : > { %2308 = vpow2.f32 %v1992_v43  ;;  %v2148_v44 = vpop.f32.mrb[8].mxu0 }
 0x326   : > { %v1995_v45 = vmul.f32 -1.442695, %v2148_v44  ;;  %v729_v46 = vpop.f32.mrb[9].mxu0 }
 0x327   : > { %v1994_v47 = vmul.f32 -1.442695, %v729_v46 }
 0x328   : > { %2310 = vpow2.f32 %v1995_v45 }
 0x329   : > { %2312 = vpow2.f32 %v1994_v47  ;;  %v2151_v48 = vpop.f32.mrb[10].mxu0 }
 0x32a   : > { %v2303_v49 = vpop.eup %2302  ;;  %v1997_v50 = vmul.f32 -1.442695, %v2151_v48  ;;  %v739_v51 = vpop.f32.mrb[11].mxu0 }
 0x32b   : > { %v2305_v52 = vpop.eup %2304  ;;  %v773_v53 = vadd.f32 1.0, %v2303_v49  ;;  %v1996_v54 = vmul.f32 -1.442695, %v739_v51 }
 0x32c   : > { %v772_v55 = vadd.f32 1.0, %v2305_v52  ;;  %2314 = vpow2.f32 %v1997_v50 }
 0x32d   : > { %2316 = vrcp.f32 %v773_v53 }
 0x32e   : > { %v2307_v56 = vpop.eup %2306  ;;  %2318 = vrcp.f32 %v772_v55 }
 0x32f   : > { %v2309_v57 = vpop.eup %2308  ;;  %v775_v58 = vadd.f32 1.0, %v2307_v56  ;;  %2320 = vpow2.f32 %v1996_v54 }
 0x330   : > { %v774_v59 = vadd.f32 1.0, %v2309_v57 }
 0x331   : > { %2322 = vrcp.f32 %v775_v58 }
 0x332   : > { %v2311_v60 = vpop.eup %2310  ;;  %2324 = vrcp.f32 %v774_v59 }
 0x333   : > { %v2313_v61 = vpop.eup %2312  ;;  %v777_v62 = vadd.f32 1.0, %v2311_v60 }
 0x334   : > { %v776_v63 = vadd.f32 1.0, %v2313_v61 }
 0x335   : > { %2326 = vrcp.f32 %v777_v62 }
 0x336   : > { %v2315_v3 = vpop.eup %2314  ;;  %2328 = vrcp.f32 %v776_v63  ;;  %v2704_v63 = vpop.f32.mrb[8].mxu1 }
 0x337   : > { %v2317_v5 = vpop.eup %2316  ;;  %v779_v6 = vadd.f32 1.0, %v2315_v3  ;;  %v1102_v3 = vrot.slane %v2704_v63, 6 }
 0x338   : > { %v2319_v7 = vpop.eup %2318  ;;  %798 = vst.msk [vmem:[%s2674_s12 + $0x8] sm:$0xff] %vm796_vm7, %v2317_v5 }
 0x339   : > { %v2321_v8 = vpop.eup %2320  ;;  %797 = vst.msk [vmem:[%s2674_s12] sm:$0xff] %vm796_vm7, %v2319_v7  ;;  %2330 = vrcp.f32 %v779_v6  ;;  %v805_v9 = vmax.f32 %v2319_v7, %v2317_v5  ;;  %v806_v10 = vmin.f32 %v2319_v7, %v2317_v5  ;;  %v2166_v5 = vpop.f32.mrb[9].mxu1 }
 0x33a   : > { %v778_v11 = vadd.f32 1.0, %v2321_v8  ;;  %v1094_v6 = vpop.f32.mrb[10].mxu1  ;;  %v1106_v8 = vrot.slane %v2704_v63, 5 }
 0x33b   : > { %v2323_v12 = vpop.eup %2322  ;;  %v807_v16 = vmin.f32 %v806_v10, -inf  ;;  %v2167_v7 = vpop.f32.mrb[11].mxu1 }
 0x33c   : > { %v2325_v13 = vpop.eup %2324  ;;  %800 = vst.msk [vmem:[%s2674_s12 + $0x18] sm:$0xff] %vm796_vm7, %v2323_v12  ;;  %2332 = vrcp.f32 %v778_v11 }
 0x33d   : > { %799 = vst.msk [vmem:[%s2674_s12 + $0x10] sm:$0xff] %vm796_vm7, %v2325_v13  ;;  %v808_v14 = vmax.f32 %v805_v9, %v2325_v13  ;;  %v809_v15 = vmin.f32 %v805_v9, %v2325_v13  ;;  %v994_v9 = vsel %vm989_vm8, %v2558_v1, 0 }
 0x33e   : > { %2153 = vmatpush3.bf16.xpose.msra.mxu0 %v994_v9 }
 0x33f   : > { %v2327_v17 = vpop.eup %2326  ;;  %v810_v18 = vmax.f32 %v806_v10, %v809_v15  ;;  %v811_v26 = vmin.f32 %v806_v10, %v809_v15  ;;  %v813_v27 = vmax.f32 %v808_v14, %v2323_v12  ;;  %v814_v28 = vmin.f32 %v808_v14, %v2323_v12  ;;  %2154 = vmatprep.subr.bf16.mxu0 %v2432_v0 }
 0x340   : > { %v2329_v29 = vpop.eup %2328  ;;  %802 = vst.msk [vmem:[%s2674_s12 + $0x28] sm:$0xff] %vm796_vm7, %v2327_v17 }
 0x341   : > { %801 = vst.msk [vmem:[%s2674_s12 + $0x20] sm:$0xff] %vm796_vm7, %v2329_v29  ;;  %v812_v30 = vmax.f32 %v807_v16, %v811_v26  ;;  %v815_v31 = vmax.f32 %v810_v18, %v814_v28  ;;  %v816_v32 = vmin.f32 %v810_v18, %v814_v28  ;;  %v818_v33 = vmax.f32 %v813_v27, %v2329_v29 }
 0x342   : > { %v819_v36 = vmin.f32 %v813_v27, %v2329_v29 }
 0x343   : > { %v2331_v37 = vpop.eup %2330  ;;  %v817_v38 = vmax.f32 %v812_v30, %v816_v32  ;;  %v823_v39 = vmax.f32 %v818_v33, %v2327_v17  ;;  %v824_v40 = vmin.f32 %v818_v33, %v2327_v17  ;;  %v838_v17 = vlaneseq }
 0x344   : > { %804 = vst.msk [vmem:[%s2674_s12 + $0x38] sm:$0xff] %vm796_vm7, %v2331_v37  ;;  %v820_v41 = vmax.f32 %v815_v31, %v819_v36  ;;  %v821_v42 = vmin.f32 %v815_v31, %v819_v36 }
 0x345   : > { %v2713_v18 = vshrl.u32 %v838_v17, 7  ;;  %v843_v28 = vand.u32 127, %v838_v17 }
 0x346   : > { %v2333_v43 = vpop.eup %2332  ;;  %v822_v44 = vmax.f32 %v817_v38, %v821_v42  ;;  %v825_v45 = vmax.f32 %v820_v41, %v824_v40  ;;  %v826_v46 = vmin.f32 %v820_v41, %v824_v40 }
 0x347   : > { %803 = vst.msk [vmem:[%s2674_s12 + $0x30] sm:$0xff] %vm796_vm7, %v2333_v43  ;;  %v828_v47 = vmax.f32 %v823_v39, %v2333_v43  ;;  %v829_v48 = vmin.f32 %v823_v39, %v2333_v43  ;;  %v840_v26 = vadd.s32 8, %v2713_v18  ;;  %v841_v1 = vadd.s32 16, %v2713_v18 }
 0x348   : > { %v827_v49 = vmax.f32 %v822_v44, %v826_v46  ;;  %v844_v27 = vmul.u32 64, %v2713_v18 }
 0x349   : > { %v830_v50 = vmax.f32 %v825_v45, %v829_v48  ;;  %v831_v51 = vmin.f32 %v825_v45, %v829_v48  ;;  %v2692_v52 = vmax.f32 %v828_v47, %v2331_v37  ;;  %v834_v53 = vmin.f32 %v828_v47, %v2331_v37 }
 0x34a   : > { %v845_v29 = vmul.u32 64, %v840_v26  ;;  %v846_v30 = vmul.u32 64, %v841_v1  ;;  %v2718_v31 = vadd.s32 %v844_v27, %v843_v28  ;;  %v997_v47 = vsel %vm989_vm8, %v2561_v2, 0 }
 0x34b   : > { %v832_v54 = vmax.f32 %v827_v49, %v831_v51  ;;  %v2694_v55 = vmax.f32 %v830_v50, %v834_v53  ;;  %v836_v56 = vmin.f32 %v830_v50, %v834_v53  ;;  %v850_v58 = vsel %vm796_vm7, %v2692_v52, -inf  ;;  %2155 = vmatpush3.bf16.xpose.msra.mxu0 %v997_v47 }
 0x34c   : > { %v2720_v32 = vadd.s32 %v845_v29, %v843_v28  ;;  %v2722_v33 = vadd.s32 %v846_v30, %v843_v28  ;;  %v1098_v48 = vrot.slane %v2704_v63, 7  ;;  %v2437_v49 = vmov 1065369472  }
 0x34d   : > { %v2696_v57 = vmax.f32 %v832_v54, %v836_v56  ;;  %v851_v59 = vsel %vm796_vm7, %v2694_v55, -inf  ;;  %v1583_v29 = vsel %vm989_vm8, %v2661_v35, 0  ;;  %v2296_v35 = vld [vmem:[%s3027_s4] sm:$0xff]  }
 0x34e   : > { %v853_v60 = vmax.f32 %v850_v58, %v851_v59 }
 0x34f   : > { %v852_v61 = vsel %vm796_vm7, %v2696_v57, -inf }
 0x350   : > { %v854_v62 = vmax.f32 %v853_v60, %v852_v61 }
 0x352   : > { %855 = vmax.xlane.f32.xlu1 %v854_v62  ;;  %2157 = vmatmul.mubr.msk.bf16.vlgmr.msra.gmra.mrb[12].mxu0 %vm989_vm8, %v2437_v49 }
 0x353   : > { %2170 = vmatprep.mubr.msk.f32.mxu0 %vm482_vm2, %v2576_v4 }
 0x363   : > { %1103 = vrot.lane.b32.xlu1 %v1102_v3, %s2436_s26  ;;  %s3041_s26 = smov 124  }
 0x367   : > { %1107 = vrot.lane.b32.xlu1 %v1106_v8, %s2434_s20 }
 0x3df   : > { %v856_v10 = vpop.xlane.xlu1 %855 }
 0x3e0   : > { %v857_v11 = vrot.slane %v856_v10, 4 }
 0x3e2   : > { %v858_v12 = vmax.f32 %v856_v10, %v857_v11 }
 0x3e3   : > { %v1104_v51 = vpop.permute.xlu1 %1103 }
 0x3e4   : > { %v859_v13 = vrot.slane %v858_v12, 2 }
 0x3e6   : > { %v860_v14 = vmax.f32 %v858_v12, %v859_v13 }
 0x3e7   : > { %v1108_v58 = vpop.permute.xlu1 %1107 }
 0x3e8   : > { %v861_v15 = vrot.slane %v860_v14, 1 }
 0x3ea   : > { %v862_v16 = vmax.f32 %v860_v14, %v861_v15 }
 0x3ec   : > { %2224 = vpush %v862_v16 }
 0x41d   : > { %s2724_s20 = spop %2224 }
 0x41e   : > { %v864_v36 = vstv %s2724_s20 }
 0x41f   : > { %vm865_vm9 = vcmp.eq.f32.partialorder %v2692_v52, %v864_v36  ;;  %vm866_vm10 = vcmp.eq.f32.partialorder %v2694_v55, %v864_v36  ;;  %vm867_vm11 = vcmp.eq.f32.partialorder %v2696_v57, %v864_v36  ;;  %v2297_v36 = vld [vmem:[%s3027_s4 + $0x8] sm:$0xff]  }
 0x420   : > { %v868_v37 = vsel %vm865_vm9, %v2718_v31, 1536  ;;  %v869_v38 = vsel %vm866_vm10, %v2720_v32, 1536  ;;  %v870_v39 = vsel %vm867_vm11, %v2722_v33, 1536 }
 0x421   : > { %v871_v40 = vsel %vm796_vm7, %v868_v37, 2147483647  ;;  %v872_v41 = vsel %vm796_vm7, %v869_v38, 2147483647  ;;  %v873_v42 = vsel %vm796_vm7, %v870_v39, 2147483647 }
 0x422   : > { %vm874_vm12 = vcmp.lt.s32.totalorder %v871_v40, %v872_v41 }
 0x423   : > { %v875_v43 = vsel %vm874_vm12, %v871_v40, %v872_v41 }
 0x424   : > { %vm876_vm13 = vcmp.lt.s32.totalorder %v875_v43, %v873_v42 }
 0x425   : > { %v877_v44 = vsel %vm876_vm13, %v875_v43, %v873_v42  ;;  %v2767_v4 = vpop.f32.mrb[12].mxu0 }
 0x426   : > { %v879_v45 = vshra.s32 %v877_v44, 16  ;;  %v878_v50 = vand.u32 65535, %v877_v44 }
 0x428   : > { %v881_v46 = vcvt.s32.f32 %v879_v45  ;;  %v880_v54 = vcvt.s32.f32 %v878_v50 }
 0x42a   : > { %882 = vmin.xlane.f32.xlu0 %v881_v46 }
 0x440   : > { %1099 = vrot.lane.b32.xlu0 %v1098_v48, %s3041_s26  ;;  %s2908_s26 = scalar_lea.vmem %s3032_s9, %s3047_s25 }
 0x4b7   : > { %v883_v53 = vpop.xlane.xlu0 %882 }
 0x4b8   : > { %vm884_vm14 = vcmp.eq.f32.partialorder %v881_v46, %v883_v53  ;;  %v889_v62 = vcvt.f32.s32 %v883_v53 }
 0x4b9   : > { %v885_v56 = vsel %vm884_vm14, %v880_v54, inf }
 0x4ba   : > { %886 = vmin.xlane.f32.xlu0 %v885_v56 }
 0x4bb   : > { %v1100_v2 = vpop.permute.xlu0 %1099 }
 0x4bc   : > { %v1110_v59 = vsel %vm476_vm4, %v2704_v63, %v1100_v2 }
 0x4bd   : > { %v1111_v60 = vsel %vm478_vm5, %v1110_v59, %v1104_v51 }
 0x4be   : > { %v1112_v61 = vsel %vm480_vm6, %v1111_v60, %v1108_v58 }
 0x4bf   : > { %2168 = vmatprep.subr.msk.mxu0 %vm507_vm3, %v1112_v61 }
 0x4c0   : > { %2169 = vmatpush3.msk.msra.mxu0 %vm507_vm3, %v1112_v61 }
 0x4c1   : > { %2171 = vmatmul.mubr.msk.f32.vlgmr.msra.gmra.mrb[16].mxu0 %vm482_vm2, %v2595_v19  ;;  %2212 = vmatprep.subr.bf16.mxu0 %v2432_v0  ;;  %v2158_v19 = vpop.f32.mrb[13].mxu0 }
 0x4c2   : > { %2173 = vmatprep.mubr.msk.f32.mxu0 %vm482_vm2, %v2601_v20  ;;  %v1036_v20 = vpop.f32.mrb[14].mxu0 }
 0x4c5   : > { %2174 = vmatmul.mubr.msk.f32.gmra.mrb[18].mxu0 %vm482_vm2, %v2612_v21  ;;  %v2159_v21 = vpop.f32.mrb[15].mxu0 }
 0x4c6   : > { %2176 = vmatprep.mubr.msk.f32.mxu0 %vm482_vm2, %v2617_v22  ;;  %v890_v22 = vshll.u32 %v889_v62, 16 }
 0x4c9   : > { %2177 = vmatmul.mubr.msk.f32.gmra.mrb[20].mxu0 %vm482_vm2, %v2626_v23 }
 0x4ca   : > { %2179 = vmatprep.mubr.msk.f32.mxu0 %vm482_vm2, %v2631_v24 }
 0x4cd   : > { %2180 = vmatmul.mubr.msk.f32.gmra.mrb[22].mxu0 %vm482_vm2, %v2640_v25 }
 0x4ce   : > { %2220 = vmatprep.mubr.msk.bf16.mxu0 %vm2433_vm0, %v2432_v0 }
 0x547   : > { %v887_v63 = vpop.xlane.xlu0 %886 }
 0x548   : > { %v888_v3 = vcvt.f32.s32 %v887_v63 }
 0x54a   : > { %v891_v5 = vadd.s32 %v890_v22, %v888_v3 }
 0x54c   : > { %v892_v23 = vrot.slane %v891_v5, 4 }
 0x54e   : > { %vm893_vm15 = vcmp.lt.s32.totalorder %v891_v5, %v892_v23 }
 0x54f   : > { %v894_v6 = vsel %vm893_vm15, %v891_v5, %v892_v23 }
 0x550   : > { %v895_v24 = vrot.slane %v894_v6, 2 }
 0x552   : > { %vm896_vm3 = vcmp.lt.s32.totalorder %v894_v6, %v895_v24 }
 0x553   : > { %v897_v7 = vsel %vm896_vm3, %v894_v6, %v895_v24 }
 0x554   : > { %v898_v25 = vrot.slane %v897_v7, 1 }
 0x556   : > { %vm899_vm5 = vcmp.lt.s32.totalorder %v897_v7, %v898_v25 }
 0x557   : > { %v900_v8 = vsel %vm899_vm5, %v897_v7, %v898_v25 }
 0x558   : > { %2226 = vpush %v900_v8 }
 0x589   : > { %s2227_s18 = spop %2226 }
 0x58a   : > { %v902_v9 = vstv %s2227_s18 }
 0x58b   : > { %vm903_vm6 = vcmp.eq.s32.totalorder %v2718_v31, %v902_v9  ;;  %vm904_vm9 = vcmp.eq.s32.totalorder %v2720_v32, %v902_v9  ;;  %vm905_vm10 = vcmp.eq.s32.totalorder %v2722_v33, %v902_v9 }
 0x58c   : > { %v2773_v10 = vsel %vm903_vm6, -inf, %v2692_v52  ;;  %v2776_v11 = vsel %vm904_vm9, -inf, %v2694_v55  ;;  %v2779_v12 = vsel %vm905_vm10, -inf, %v2696_v57  ;;  %v1580_v55 = vsel %vm989_vm8, %v2657_v34, 0 }
 0x58d   : > { %v910_v13 = vsel %vm796_vm7, %v2773_v10, -inf  ;;  %v911_v14 = vsel %vm796_vm7, %v2776_v11, -inf  ;;  %v912_v16 = vsel %vm796_vm7, %v2779_v12, -inf  ;;  %vm987_vm6 = vcmask 0  }
 0x58e   : > { %v913_v15 = vmax.f32 %v910_v13, %v911_v14 }
 0x590   : > { %v914_v17 = vmax.f32 %v913_v15, %v912_v16  ;;  %v1039_v15 = vmul.f32 0.0625, %v2767_v4 }
 0x592   : > { %915 = vmax.xlane.f32.xlu1 %v914_v17 }
 0x594   : > { %v2172_v52 = vpop.f32.mrb[16].mxu0 }
 0x595   : > { %v1182_v26 = vpop.f32.mrb[17].mxu0 }
 0x596   : > { %2184 = vmatprep.mubr.msk.f32.mxu1 %vm482_vm2, %v1182_v26 }
 0x597   : > { %2185 = vmatmul.mubr.msk.f32.vlgmr.msra.gmra.mrb[12].mxu1 %vm482_vm2, %v2172_v52 }
 0x598   : > { %v2175_v57 = vpop.f32.mrb[18].mxu0  ;;  %2197 = vmatpush3.bf16.xpose.msra.mxu1 %v1580_v55 }
 0x599   : > { %v1192_v1 = vpop.f32.mrb[19].mxu0  ;;  %2198 = vmatprep.subr.bf16.mxu1 %v2432_v0 }
 0x59a   : > { %2187 = vmatprep.mubr.msk.f32.mxu1 %vm482_vm2, %v1192_v1 }
 0x59b   : > { %2188 = vmatmul.mubr.msk.f32.gmra.mrb[14].mxu1 %vm482_vm2, %v2175_v57 }
 0x59c   : > { %v2178_v27 = vpop.f32.mrb[20].mxu0 }
 0x59d   : > { %v1202_v28 = vpop.f32.mrb[21].mxu0 }
 0x59e   : > { %2190 = vmatprep.mubr.msk.f32.mxu1 %vm482_vm2, %v1202_v28 }
 0x59f   : > { %2191 = vmatmul.mubr.msk.f32.gmra.mrb[16].mxu1 %vm482_vm2, %v2178_v27 }
 0x5a0   : > { %v2181_v34 = vpop.f32.mrb[22].mxu0  ;;  %2199 = vmatpush3.bf16.xpose.msra.mxu1 %v1583_v29 }
 0x5a1   : > { %v1212_v30 = vpop.f32.mrb[23].mxu0  ;;  %2204 = vmatprep.subr.bf16.mxu1 %v2432_v0 }
 0x5a2   : > { %2193 = vmatprep.mubr.msk.f32.mxu1 %vm482_vm2, %v1212_v30 }
 0x5a3   : > { %2194 = vmatmul.mubr.msk.f32.gmra.mrb[18].mxu1 %vm482_vm2, %v2181_v34 }
 0x5a4   : > { %2200 = vmatprep.mubr.msk.bf16.mxu1 %vm2433_vm0, %v2432_v0 }
 0x5a7   : > { %2201 = vmatmul.mubr.msk.bf16.vlgmr.msra.gmra.mrb[20].mxu1 %vm989_vm8, %v2437_v49 }
 0x5a8   : > { %2208 = vmatprep.mubr.msk.bf16.mxu1 %vm2433_vm0, %v2432_v0  ;;  %2205 = vmatpush3.bf16.msra.mxu1 %v2296_v35 }
 0x5a9   : > { %2206 = vmatprep.subr.bf16.mxu1 %v2432_v0 }
 0x5ac   : > { %2207 = vmatpush3.bf16.msra.mxu1 %v2297_v36 }
 0x61f   : > { %v916_v37 = vpop.xlane.xlu1 %915 }
 0x620   : > { %v917_v38 = vrot.slane %v916_v37, 4 }
 0x622   : > { %v918_v39 = vmax.f32 %v916_v37, %v917_v38 }
 0x624   : > { %v919_v40 = vrot.slane %v918_v39, 2 }
 0x626   : > { %v920_v41 = vmax.f32 %v918_v39, %v919_v40 }
 0x628   : > { %v921_v42 = vrot.slane %v920_v41, 1 }
 0x62a   : > { %v922_v43 = vmax.f32 %v920_v41, %v921_v42 }
 0x62c   : > { %2228 = vpush %v922_v43 }
 0x65d   : > { %s2814_s21 = spop %2228 }
 0x65e   : > { %v924_v44 = vstv %s2814_s21  ;;  %s969_s27 = sadd.f32 %s2814_s21, %s2724_s20 }
 0x65f   : > { %vm925_vm0 = vcmp.eq.f32.partialorder %v2773_v10, %v924_v44  ;;  %vm926_vm2 = vcmp.eq.f32.partialorder %v2776_v11, %v924_v44  ;;  %vm927_vm8 = vcmp.eq.f32.partialorder %v2779_v12, %v924_v44 }
 0x660   : > { %v928_v45 = vsel %vm925_vm0, %v2718_v31, 1536  ;;  %v929_v46 = vsel %vm926_vm2, %v2720_v32, 1536  ;;  %v930_v47 = vsel %vm927_vm8, %v2722_v33, 1536 }
 0x661   : > { %v931_v48 = vsel %vm796_vm7, %v928_v45, 2147483647  ;;  %v932_v49 = vsel %vm796_vm7, %v929_v46, 2147483647  ;;  %v933_v50 = vsel %vm796_vm7, %v930_v47, 2147483647 }
 0x662   : > { %vm934_vm11 = vcmp.lt.s32.totalorder %v931_v48, %v932_v49 }
 0x663   : > { %v935_v51 = vsel %vm934_vm11, %v931_v48, %v932_v49 }
 0x664   : > { %vm936_vm12 = vcmp.lt.s32.totalorder %v935_v51, %v933_v50 }
 0x665   : > { %v2826_v53 = vsel %vm936_vm12, %v935_v51, %v933_v50 }
 0x666   : > { %v939_v54 = vshra.s32 %v2826_v53, 16  ;;  %v938_v48 = vand.u32 65535, %v2826_v53  ;;  %v2300_v53 = vld [vmem:[%s3029_s6 + $0x10] sm:$0xff]  }
 0x668   : > { %v2829_v56 = vcvt.s32.f32 %v939_v54  ;;  %v940_v50 = vcvt.s32.f32 %v938_v48  ;;  %v2298_v54 = vld [vmem:[%s3029_s6] sm:$0xff]  }
 0x669   : > { %2213 = vmatpush3.bf16.msra.mxu0 %v2298_v54 }
 0x66a   : > { %942 = vmin.xlane.f32.xlu0 %v2829_v56  ;;  %v2186_v2 = vpop.f32.mrb[12].mxu1  ;;  %2214 = vmatprep.subr.bf16.mxu0 %v2432_v0 }
 0x66b   : > { %v2025_v58 = vmul.f32 -1.442695, %v2186_v2  ;;  %v1311_v59 = vpop.f32.mrb[13].mxu1  ;;  %v2299_v2 = vld [vmem:[%s3029_s6 + $0x8] sm:$0xff]  }
 0x66c   : > { %v2024_v60 = vmul.f32 -1.442695, %v1311_v59 }
 0x66d   : > { %2334 = vpow2.f32 %v2025_v58  ;;  %2215 = vmatpush3.bf16.msra.mxu0 %v2299_v2 }
 0x66e   : > { %2336 = vpow2.f32 %v2024_v60  ;;  %v2189_v61 = vpop.f32.mrb[14].mxu1  ;;  %2216 = vmatprep.subr.bf16.mxu0 %v2432_v0 }
 0x66f   : > { %v2027_v19 = vmul.f32 -1.442695, %v2189_v61  ;;  %v1321_v20 = vpop.f32.mrb[15].mxu1 }
 0x670   : > { %v2026_v21 = vmul.f32 -1.442695, %v1321_v20 }
 0x671   : > { %2338 = vpow2.f32 %v2027_v19  ;;  %2217 = vmatpush3.bf16.msra.mxu0 %v2300_v53 }
 0x672   : > { %2340 = vpow2.f32 %v2026_v21  ;;  %v2192_v62 = vpop.f32.mrb[16].mxu1  ;;  %2218 = vmatprep.subr.bf16.mxu0 %v2432_v0 }
 0x673   : > { %v2029_v63 = vmul.f32 -1.442695, %v2192_v62  ;;  %v1331_v22 = vpop.f32.mrb[17].mxu1 }
 0x674   : > { %v2028_v3 = vmul.f32 -1.442695, %v1331_v22 }
 0x675   : > { %2342 = vpow2.f32 %v2029_v63 }
 0x676   : > { %2344 = vpow2.f32 %v2028_v3  ;;  %v2195_v5 = vpop.f32.mrb[18].mxu1 }
 0x677   : > { %v2335_v23 = vpop.eup %2334  ;;  %v2031_v6 = vmul.f32 -1.442695, %v2195_v5  ;;  %v1341_v24 = vpop.f32.mrb[19].mxu1 }
 0x678   : > { %v2337_v7 = vpop.eup %2336  ;;  %v1375_v25 = vadd.f32 1.0, %v2335_v23  ;;  %v2030_v8 = vmul.f32 -1.442695, %v1341_v24 }
 0x679   : > { %v1374_v9 = vadd.f32 1.0, %v2337_v7  ;;  %2346 = vpow2.f32 %v2031_v6 }
 0x67a   : > { %2348 = vrcp.f32 %v1375_v25  ;;  %v1619_v13 = vpop.f32.mrb[20].mxu1 }
 0x67b   : > { %v2339_v14 = vpop.eup %2338  ;;  %2350 = vrcp.f32 %v1374_v9  ;;  %v1625_v16 = vmul.f32 0.0625, %v1619_v13  ;;  %v2202_v17 = vpop.f32.mrb[21].mxu1 }
 0x67c   : > { %v2341_v52 = vpop.eup %2340  ;;  %v1377_v26 = vadd.f32 1.0, %v2339_v14  ;;  %2352 = vpow2.f32 %v2030_v8  ;;  %v1622_v55 = vpop.f32.mrb[22].mxu1 }
 0x67d   : > { %v1376_v57 = vadd.f32 1.0, %v2341_v52  ;;  %v1627_v1 = vrot.slane %v1625_v16, 7  ;;  %v2203_v27 = vpop.f32.mrb[23].mxu1 }
 0x67e   : > { %2354 = vrcp.f32 %v1377_v26 }
 0x67f   : > { %v2343_v28 = vpop.eup %2342  ;;  %2356 = vrcp.f32 %v1376_v57  ;;  %v1629_v29 = vsel %vm476_vm4, %v1039_v15, %v1627_v1 }
 0x680   : > { %v2345_v34 = vpop.eup %2344  ;;  %v1379_v30 = vadd.f32 1.0, %v2343_v28  ;;  %v1630_v4 = vpack.c.bf16 %v1629_v29, %v1629_v29 }
 0x681   : > { %v1378_v35 = vadd.f32 1.0, %v2345_v34 }
 0x682   : > { %2358 = vrcp.f32 %v1379_v30  ;;  %2209 = vmatmul.mubr.msk.bf16.vlgmr.msra.gmra.mrb[24].mxu1 %vm419_vm1, %v1630_v4 }
 0x683   : > { %v2347_v36 = vpop.eup %2346  ;;  %2360 = vrcp.f32 %v1378_v35 }
 0x684   : > { %v2349_v37 = vpop.eup %2348  ;;  %v1381_v38 = vadd.f32 1.0, %v2347_v36 }
 0x685   : > { %v2351_v39 = vpop.eup %2350  ;;  %2033 = vst.msk [vmem:[%s2674_s12 + $0x48] sm:$0xff] %vm796_vm7, %v2349_v37 }
 0x686   : > { %v2353_v40 = vpop.eup %2352  ;;  %2032 = vst.msk [vmem:[%s2674_s12 + $0x40] sm:$0xff] %vm796_vm7, %v2351_v39  ;;  %2362 = vrcp.f32 %v1381_v38  ;;  %v1407_v58 = vmax.f32 %v2351_v39, %v2349_v37  ;;  %v1408_v59 = vmin.f32 %v2351_v39, %v2349_v37  ;;  %v2042_v37 = vld [vmem:[%s3028_s5] ss:$0 sm:$0xff] }
 0x687   : > { %v1380_v41 = vadd.f32 1.0, %v2353_v40 }
 0x688   : > { %v2355_v42 = vpop.eup %2354  ;;  %v1409_v60 = vmin.f32 %v1408_v59, -inf }
 0x689   : > { %v2357_v43 = vpop.eup %2356  ;;  %2035 = vst.msk [vmem:[%s2674_s12 + $0x58] sm:$0xff] %vm796_vm7, %v2355_v42  ;;  %2364 = vrcp.f32 %v1380_v41 }
 0x68a   : > { %2034 = vst.msk [vmem:[%s2674_s12 + $0x50] sm:$0xff] %vm796_vm7, %v2357_v43  ;;  %v1410_v61 = vmax.f32 %v1407_v58, %v2357_v43  ;;  %v1411_v19 = vmin.f32 %v1407_v58, %v2357_v43 }
 0x68c   : > { %v2359_v44 = vpop.eup %2358  ;;  %v1412_v20 = vmax.f32 %v1408_v59, %v1411_v19  ;;  %v1413_v21 = vmin.f32 %v1408_v59, %v1411_v19  ;;  %v1415_v62 = vmax.f32 %v1410_v61, %v2355_v42  ;;  %v1416_v63 = vmin.f32 %v1410_v61, %v2355_v42 }
 0x68d   : > { %v2361_v45 = vpop.eup %2360  ;;  %2037 = vst.msk [vmem:[%s2674_s12 + $0x68] sm:$0xff] %vm796_vm7, %v2359_v44 }
 0x68e   : > { %2036 = vst.msk [vmem:[%s2674_s12 + $0x60] sm:$0xff] %vm796_vm7, %v2361_v45  ;;  %v1414_v22 = vmax.f32 %v1409_v60, %v1413_v21  ;;  %v1417_v3 = vmax.f32 %v1412_v20, %v1416_v63  ;;  %v1418_v5 = vmin.f32 %v1412_v20, %v1416_v63  ;;  %v1420_v23 = vmax.f32 %v1415_v62, %v2361_v45 }
 0x68f   : > { %v1421_v6 = vmin.f32 %v1415_v62, %v2361_v45 }
 0x690   : > { %v2363_v46 = vpop.eup %2362  ;;  %v1419_v0 = vmax.f32 %v1414_v22, %v1418_v5  ;;  %v1425_v24 = vmax.f32 %v1420_v23, %v2359_v44  ;;  %v1426_v7 = vmin.f32 %v1420_v23, %v2359_v44 }
 0x691   : > { %2039 = vst.msk [vmem:[%s2674_s12 + $0x78] sm:$0xff] %vm796_vm7, %v2363_v46  ;;  %v1422_v25 = vmax.f32 %v1417_v3, %v1421_v6  ;;  %v1423_v8 = vmin.f32 %v1417_v3, %v1421_v6 }
 0x693   : > { %v2365_v47 = vpop.eup %2364  ;;  %v1424_v14 = vmax.f32 %v1419_v0, %v1423_v8  ;;  %v1427_v15 = vmax.f32 %v1422_v25, %v1426_v7  ;;  %v1428_v16 = vmin.f32 %v1422_v25, %v1426_v7 }
 0x694   : > { %2038 = vst.msk [vmem:[%s2674_s12 + $0x70] sm:$0xff] %vm796_vm7, %v2365_v47  ;;  %v1430_v9 = vmax.f32 %v1425_v24, %v2365_v47  ;;  %v1431_v13 = vmin.f32 %v1425_v24, %v2365_v47 }
 0x695   : > { %v1429_v26 = vmax.f32 %v1424_v14, %v1428_v16 }
 0x696   : > { %v2871_v17 = vmax.f32 %v1430_v9, %v2363_v46  ;;  %v1436_v52 = vmin.f32 %v1430_v9, %v2363_v46  ;;  %v1432_v55 = vmax.f32 %v1427_v15, %v1431_v13  ;;  %v1433_v57 = vmin.f32 %v1427_v15, %v1431_v13 }
 0x698   : > { %v1434_v1 = vmax.f32 %v1429_v26, %v1433_v57  ;;  %v2873_v27 = vmax.f32 %v1432_v55, %v1436_v52  ;;  %v1438_v28 = vmin.f32 %v1432_v55, %v1436_v52  ;;  %v1440_v29 = vsel %vm796_vm7, %v2871_v17, -inf }
 0x69a   : > { %v2877_v34 = vmax.f32 %v1434_v1, %v1438_v28  ;;  %v1441_v30 = vsel %vm796_vm7, %v2873_v27, -inf }
 0x69b   : > { %v1443_v4 = vmax.f32 %v1440_v29, %v1441_v30 }
 0x69c   : > { %v1442_v35 = vsel %vm796_vm7, %v2877_v34, -inf }
 0x69d   : > { %v1444_v36 = vmax.f32 %v1443_v4, %v1442_v35 }
 0x6f7   : > { %v2852_v49 = vpop.xlane.xlu0 %942 }
 0x6f8   : > { %vm944_vm1 = vcmp.eq.f32.partialorder %v2829_v56, %v2852_v49  ;;  %v2301_v56 = vld [vmem:[%s3029_s6 + $0x18] sm:$0xff]   ;;  %v949_v45 = vcvt.f32.s32 %v2852_v49 }
 0x6f9   : > { %v945_v51 = vsel %vm944_vm1, %v940_v50, inf  ;;  %2219 = vmatpush3.bf16.msra.mxu0 %v2301_v56 }
 0x6fa   : > { %946 = vmin.xlane.f32.xlu0 %v945_v51  ;;  %v950_v47 = vshll.u32 %v949_v45, 16 }
 0x6fe   : > { %1445 = vmax.xlane.f32.xlu0 %v1444_v36 }
 0x755   : > { %v1691_v38 = vpop.f32.mrb[24].mxu1 }
 0x756   : > { %v1692_v39 = vadd.f32 %v2042_v37, %v1691_v38  ;;  %v2210_v40 = vpop.f32.mrb[25].mxu1 }
 0x757   : > { %v1694_v41 = vpop.f32.mrb[26].mxu1 }
 0x758   : > { %v1697_v42 = vmax.f32 %v1692_v39, 0.0  ;;  %v2211_v43 = vpop.f32.mrb[27].mxu1 }
 0x75a   : > { %v1698_v44 = vpack.c.bf16 %v1697_v42, %v1697_v42 }
 0x75c   : > { %2221 = vmatmul.mubr.msk.bf16.vlgmr.msra.gmra.mrb[24].mxu0 %vm796_vm7, %v1698_v44 }
 0x787   : > { %v947_v46 = vpop.xlane.xlu0 %946 }
 0x788   : > { %v948_v48 = vcvt.f32.s32 %v947_v46 }
 0x78a   : > { %v951_v50 = vadd.s32 %v950_v47, %v948_v48 }
 0x78b   : > { %v1446_v6 = vpop.xlane.xlu0 %1445 }
 0x78c   : > { %v952_v51 = vrot.slane %v951_v50, 4 }
 0x78e   : > { %vm953_vm4 = vcmp.lt.s32.totalorder %v951_v50, %v952_v51 }
 0x78f   : > { %v954_v54 = vsel %vm953_vm4, %v951_v50, %v952_v51 }
 0x790   : > { %v955_v2 = vrot.slane %v954_v54, 2 }
 0x792   : > { %vm956_vm13 = vcmp.lt.s32.totalorder %v954_v54, %v955_v2 }
 0x793   : > { %v957_v53 = vsel %vm956_vm13, %v954_v54, %v955_v2 }
 0x794   : > { %v958_v56 = vrot.slane %v957_v53, 1 }
 0x796   : > { %vm959_vm14 = vcmp.lt.s32.totalorder %v957_v53, %v958_v56 }
 0x797   : > { %v960_v58 = vsel %vm959_vm14, %v957_v53, %v958_v56 }
 0x798   : > { %2230 = vpush %v960_v58 }
 0x7c9   : > { %s2231_s18 = spop %2230 }
 0x7ca   : > { %v962_v59 = vstv %s2231_s18 }
 0x7cb   : > { %vm963_vm15 = vcmp.eq.s32.totalorder %v2718_v31, %v962_v59  ;;  %vm964_vm3 = vcmp.eq.s32.totalorder %v2720_v32, %v962_v59  ;;  %vm965_vm5 = vcmp.eq.s32.totalorder %v2722_v33, %v962_v59 }
 0x7cc   : > { %v966_v49 = vsel %vm963_vm15, -inf, %v2773_v10  ;;  %v967_v60 = vsel %vm964_vm3, -inf, %v2776_v11  ;;  %v968_v61 = vsel %vm965_vm5, -inf, %v2779_v12  ;;  %v1447_v10 = vrot.slane %v1446_v6, 4 }
 0x7cd   : > { %v970_v19 = vsel %vm796_vm7, %v966_v49, -inf  ;;  %v971_v20 = vsel %vm796_vm7, %v967_v60, -inf  ;;  %v972_v62 = vsel %vm796_vm7, %v968_v61, -inf }
 0x7ce   : > { %v973_v21 = vmax.f32 %v970_v19, %v971_v20  ;;  %v1448_v11 = vmax.f32 %v1446_v6, %v1447_v10 }
 0x7d0   : > { %v974_v63 = vmax.f32 %v973_v21, %v972_v62  ;;  %v1449_v12 = vrot.slane %v1448_v11, 2 }
 0x7d2   : > { %975 = vmax.xlane.f32.xlu1 %v974_v63  ;;  %v1450_v25 = vmax.f32 %v1448_v11, %v1449_v12 }
 0x7d4   : > { %v1451_v13 = vrot.slane %v1450_v25, 1 }
 0x7d6   : > { %v1452_v16 = vmax.f32 %v1450_v25, %v1451_v13 }
 0x82f   : > { %v2897_v22 = vpop.f32.mrb[24].mxu0 }
 0x830   : > { %v2222_v3 = vpop.f32.mrb[25].mxu0 }
 0x831   : > { %v1778_v5 = vpop.f32.mrb[26].mxu0 }
 0x832   : > { %v2223_v23 = vpop.f32.mrb[27].mxu0 }
 0x85f   : > { %v976_v0 = vpop.xlane.xlu1 %975 }
 0x860   : > { %v977_v24 = vrot.slane %v976_v0, 4 }
 0x862   : > { %v978_v7 = vmax.f32 %v976_v0, %v977_v24 }
 0x864   : > { %v979_v8 = vrot.slane %v978_v7, 2 }
 0x866   : > { %v980_v9 = vmax.f32 %v978_v7, %v979_v8 }
 0x868   : > { %v981_v14 = vrot.slane %v980_v9, 1 }
 0x86a   : > { %v982_v15 = vmax.f32 %v980_v9, %v981_v14  ;;  %v2046_v9 = vld [vmem:[%s3030_s7] ss:$0 sm:$0xff] }
 0x86b   : > { %v1776_v14 = vadd.f32 %v2046_v9, %v2897_v22  ;;  %v2438_v22 = vmov 1966171168  }
 0x86c   : > { %2232 = vpush %v982_v15 }
 0x86d   : > { %2234 = vpush %v1452_v16 }
 0x89d   : > { %s2233_s12 = spop %2232 }
 0x89e   : > { %s984_s28 = sadd.f32 %s2233_s12, %s969_s27  ;;  %s2901_s30 = spop %2234 }
 0x89f   : > { %v1454_v52 = vstv %s2901_s30  ;;  %s368_s12 = sand.u32 1, %s2422_s14  }
 0x8a0   : > { %s985_s18 = smul.f32 0.33333334, %s984_s28  ;;  %vm1455_vm9 = vcmp.eq.f32.partialorder %v2871_v17, %v1454_v52  ;;  %vm1456_vm10 = vcmp.eq.f32.partialorder %v2873_v27, %v1454_v52  ;;  %vm1457_vm0 = vcmp.eq.f32.partialorder %v2877_v34, %v1454_v52  ;;  %s1961_s28 = sshll.u32 %s368_s12, 1 }
 0x8a1   : > { %v1458_v26 = vsel %vm1455_vm9, %v2718_v31, 1536  ;;  %v1459_v55 = vsel %vm1456_vm10, %v2720_v32, 1536  ;;  %v1460_v57 = vsel %vm1457_vm0, %v2722_v33, 1536  ;;  %s370_s29 = scalar_lea.vmem [#allocation2], %s1961_s28 }
 0x8a2   : > { %v986_v1 = vstv %s985_s18  ;;  %v1461_v28 = vsel %vm796_vm7, %v1458_v26, 2147483647  ;;  %v1462_v29 = vsel %vm796_vm7, %v1459_v55, 2147483647  ;;  %v1463_v30 = vsel %vm796_vm7, %v1460_v57, 2147483647 }
 0x8a3   : > { %988 = vst.msk [vmem:[%s2908_s26] sm:$0x1] %vm987_vm6, %v986_v1  ;;  %vm1464_vm2 = vcmp.lt.s32.totalorder %v1461_v28, %v1462_v29  ;;  %v1781_v26 = vmul.f32 %v1776_v14, %v1776_v14  ;;  %s2059_s18 = sshll.u32 %s2518_s17, 5  ;;  %s2439_s17 = smov [#allocation2]  }
 0x8a4   : > { %v1465_v4 = vsel %vm1464_vm2, %v1461_v28, %v1462_v29  ;;  %s2972_s28 = scalar_lea.hbm %s3033_s10, %s2059_s18 }
 0x8a5   : > { %vm1466_vm8 = vcmp.lt.s32.totalorder %v1465_v4, %v1463_v30 }
 0x8a6   : > { %v1467_v35 = vsel %vm1466_vm8, %v1465_v4, %v1463_v30  ;;  %vm1782_vm8 = vcmask 123904  }
 0x8a7   : > { %v1469_v36 = vshra.s32 %v1467_v35, 16  ;;  %v1468_v38 = vand.u32 65535, %v1467_v35  ;;  %v1783_v55 = vsel %vm1782_vm8, %v1781_v26, 0.0 }
 0x8a9   : > { %v1471_v37 = vcvt.s32.f32 %v1469_v36  ;;  %v1470_v40 = vcvt.s32.f32 %v1468_v38 }
 0x8ab   : > { %1472 = vmin.xlane.f32.xlu1 %v1471_v37 }
 0x938   : > { %v1473_v39 = vpop.xlane.xlu1 %1472 }
 0x939   : > { %vm1474_vm11 = vcmp.eq.f32.partialorder %v1471_v37, %v1473_v39  ;;  %v1479_v42 = vcvt.f32.s32 %v1473_v39  ;;  %v1791_v37 = vunpack.c.l.s4 %v2438_v22 }
 0x93a   : > { %v1475_v41 = vsel %vm1474_vm11, %v1470_v40, inf }
 0x93b   : > { %1476 = vmin.xlane.f32.xlu0 %v1475_v41  ;;  %v1480_v44 = vshll.u32 %v1479_v42, 16  ;;  %v1792_v40 = vunpack.c.0.s8 %v1791_v37 }
 0x9c8   : > { %v1477_v43 = vpop.xlane.xlu0 %1476 }
 0x9c9   : > { %v1478_v45 = vcvt.f32.s32 %v1477_v43  ;;  %v1795_v43 = vsub.s32 %v1792_v40, %v2713_v18 }
 0x9cb   : > { %v1481_v46 = vadd.s32 %v1480_v44, %v1478_v45 }
 0x9cd   : > { %v1482_v47 = vrot.slane %v1481_v46, 4 }
 0x9cf   : > { %vm1483_vm12 = vcmp.lt.s32.totalorder %v1481_v46, %v1482_v47 }
 0x9d0   : > { %v1484_v48 = vsel %vm1483_vm12, %v1481_v46, %v1482_v47 }
 0x9d1   : > { %v1485_v50 = vrot.slane %v1484_v48, 2 }
 0x9d3   : > { %vm1486_vm1 = vcmp.lt.s32.totalorder %v1484_v48, %v1485_v50 }
 0x9d4   : > { %v1487_v51 = vsel %vm1486_vm1, %v1484_v48, %v1485_v50 }
 0x9d5   : > { %v1488_v54 = vrot.slane %v1487_v51, 1 }
 0x9d7   : > { %vm1489_vm4 = vcmp.lt.s32.totalorder %v1487_v51, %v1488_v54 }
 0x9d8   : > { %v1490_v2 = vsel %vm1489_vm4, %v1487_v51, %v1488_v54  ;;  %vm1814_vm4 = vcmask 122880  }
 0x9d9   : > { %2236 = vpush %v1490_v2 }
 0xa0a   : > { %s2237_s25 = spop %2236 }
 0xa0b   : > { %v1492_v53 = vstv %s2237_s25  ;;  %s1849_s25 = sshll.u32 %s370_s29, 4  ;;  %s2974_s25 = int_to_ptr.vmem [resolvable:$true] %s1849_s25 }
 0xa0c   : > { %vm1493_vm13 = vcmp.eq.s32.totalorder %v2718_v31, %v1492_v53  ;;  %vm1494_vm14 = vcmp.eq.s32.totalorder %v2720_v32, %v1492_v53  ;;  %vm1495_vm15 = vcmp.eq.s32.totalorder %v2722_v33, %v1492_v53  ;;  %s2368_s0 = scalar_lea.vmem %s2974_s25, 32 }
 0xa0d   : > { %v2925_v56 = vsel %vm1493_vm13, -inf, %v2871_v17  ;;  %v2928_v58 = vsel %vm1494_vm14, -inf, %v2873_v27  ;;  %v2931_v59 = vsel %vm1495_vm15, -inf, %v2877_v34  ;;  %p2369_p11 = scmp.ne.s32.totalorder %s2974_s25, %s2368_s0 }
 0xa0e   : > { %v1500_v49 = vsel %vm796_vm7, %v2925_v56, -inf  ;;  %v1501_v60 = vsel %vm796_vm7, %v2928_v58, -inf  ;;  %v1502_v19 = vsel %vm796_vm7, %v2931_v59, -inf }
 0xa0f   : > { %v1503_v61 = vmax.f32 %v1500_v49, %v1501_v60  ;;  %p2370_p12 = pnand %p2369_p11, %p2535_p5 }
 0xa11   : > { %v1504_v20 = vmax.f32 %v1503_v61, %v1502_v19  ;;  %p2371_p13 = pneg %p2370_p12 }
 0xa13   : > { %1505 = vmax.xlane.f32.xlu1 %v1504_v20 }
 0xaa0   : > { %v1506_v17 = vpop.xlane.xlu1 %1505 }
 0xaa1   : > { %v1507_v21 = vrot.slane %v1506_v17, 4 }
 0xaa3   : > { %v1508_v62 = vmax.f32 %v1506_v17, %v1507_v21 }
 0xaa5   : > { %v1509_v27 = vrot.slane %v1508_v62, 2 }
 0xaa7   : > { %v1510_v63 = vmax.f32 %v1508_v62, %v1509_v27 }
 0xaa9   : > { %v1511_v3 = vrot.slane %v1510_v63, 1 }
 0xaab   : > { %v1512_v34 = vmax.f32 %v1510_v63, %v1511_v3 }
 0xaad   : > { %2238 = vpush %v1512_v34 }
 0xade   : > { %s2939_s20 = spop %2238 }
 0xadf   : > { %v1514_v5 = vstv %s2939_s20 }
 0xae0   : > { %vm1515_vm3 = vcmp.eq.f32.partialorder %v2925_v56, %v1514_v5  ;;  %vm1516_vm5 = vcmp.eq.f32.partialorder %v2928_v58, %v1514_v5  ;;  %vm1517_vm9 = vcmp.eq.f32.partialorder %v2931_v59, %v1514_v5 }
 0xae1   : > { %v1518_v23 = vsel %vm1515_vm3, %v2718_v31, 1536  ;;  %v1519_v6 = vsel %vm1516_vm5, %v2720_v32, 1536  ;;  %v1520_v10 = vsel %vm1517_vm9, %v2722_v33, 1536 }
 0xae2   : > { %v1521_v11 = vsel %vm796_vm7, %v1518_v23, 2147483647  ;;  %v1522_v12 = vsel %vm796_vm7, %v1519_v6, 2147483647  ;;  %v1523_v0 = vsel %vm796_vm7, %v1520_v10, 2147483647 }
 0xae3   : > { %vm1524_vm10 = vcmp.lt.s32.totalorder %v1521_v11, %v1522_v12 }
 0xae4   : > { %v1525_v24 = vsel %vm1524_vm10, %v1521_v11, %v1522_v12 }
 0xae5   : > { %vm1526_vm0 = vcmp.lt.s32.totalorder %v1525_v24, %v1523_v0 }
 0xae6   : > { %v1527_v7 = vsel %vm1526_vm0, %v1525_v24, %v1523_v0 }
 0xae7   : > { %v1529_v25 = vshra.s32 %v1527_v7, 16  ;;  %v1528_v13 = vand.u32 65535, %v1527_v7 }
 0xae9   : > { %v1531_v8 = vcvt.s32.f32 %v1529_v25  ;;  %v1530_v16 = vcvt.s32.f32 %v1528_v13 }
 0xaeb   : > { %1532 = vmin.xlane.f32.xlu0 %v1531_v8 }
 0xb78   : > { %v1533_v15 = vpop.xlane.xlu0 %1532 }
 0xb79   : > { %vm1534_vm2 = vcmp.eq.f32.partialorder %v1531_v8, %v1533_v15  ;;  %v1539_v57 = vcvt.f32.s32 %v1533_v15 }
 0xb7a   : > { %v1535_v52 = vsel %vm1534_vm2, %v1530_v16, inf }
 0xb7b   : > { %1536 = vmin.xlane.f32.xlu1 %v1535_v52  ;;  %v1540_v28 = vshll.u32 %v1539_v57, 16 }
 0xb7f   : > { %1784 = vadd.xlane.f32.xlu1 %v1783_v55 }
 0xc08   : > { %v1537_v1 = vpop.xlane.xlu1 %1536 }
 0xc09   : > { %v1538_v29 = vcvt.f32.s32 %v1537_v1 }
 0xc0b   : > { %v1541_v30 = vadd.s32 %v1540_v28, %v1538_v29 }
 0xc0c   : > { %v1785_v4 = vpop.xlane.xlu1 %1784 }
 0xc0d   : > { %v1542_v35 = vrot.slane %v1541_v30, 4  ;;  %v1786_v36 = vmax.f32 %v1785_v4, 1e-24 }
 0xc0f   : > { %vm1543_vm11 = vcmp.lt.s32.totalorder %v1541_v30, %v1542_v35  ;;  %2366 = vrsqrt.f32 %v1786_v36 }
 0xc10   : > { %v1544_v38 = vsel %vm1543_vm11, %v1541_v30, %v1542_v35 }
 0xc11   : > { %v1545_v39 = vrot.slane %v1544_v38, 2 }
 0xc13   : > { %vm1546_vm12 = vcmp.lt.s32.totalorder %v1544_v38, %v1545_v39 }
 0xc14   : > { %v1547_v41 = vsel %vm1546_vm12, %v1544_v38, %v1545_v39 }
 0xc15   : > { %v1548_v42 = vrot.slane %v1547_v41, 1 }
 0xc17   : > { %vm1549_vm1 = vcmp.lt.s32.totalorder %v1547_v41, %v1548_v42 }
 0xc18   : > { %v1550_v44 = vsel %vm1549_vm1, %v1547_v41, %v1548_v42 }
 0xc19   : > { %v2367_v45 = vpop.eup %2366  ;;  %2240 = vpush %v1550_v44 }
 0xc1a   : > { %v1788_v46 = vmul.f32 %v2367_v45, %v1776_v14 }
 0xc1c   : > { %v1796_v47 = vrot.slane %v1788_v46, %v1795_v43 }
 0xc1e   : > { %v1797_v48 = vcombine.high %v1796_v47, %v1796_v47  ;;  %v1804_v50 = vrot.slane %v1796_v47, %v1795_v43 }
 0xc20   : > { %v1811_v51 = vrot.slane %v1797_v48, %v1795_v43  ;;  %1815 = vst.msk [vmem:[%s370_s29] sm:$0x1] %vm1814_vm4, %v1804_v50 }
 0xc22   : > { %1816 = vst.msk [vmem:[%s370_s29 + $0x1] sm:$0x1] %vm1814_vm4, %v1811_v51  ;;  %s2372_s29 = sshll.u32 %s2439_s17, 4  ;;  %s2373_s29 = int_to_ptr.vmem [resolvable:$false] %s2372_s29 }
 0xc23   : > { %s2374_s1 = scalar_lea.vmem %s2373_s29, 64  ;;  %p2375_p0 = scmp.lt.s32.totalorder %s2974_s25, %s2373_s29 }
 0xc24   : > { %p2376_p1 = scmp.lt.s32.totalorder %s2374_s1, %s2368_s0 }
 0xc26   : > { %p2377_p2 = por %p2376_p1, %p2375_p0 }
 0xc28   : > { %p2378_p3 = pnand %p2377_p2, %p2371_p13 }
 0xc4a   : > { %s2241_s11 = spop %2240 }
 0xc4b   : > { %v1552_v54 = vstv %s2241_s11  ;;  %s2978_s11 = scalar_lea.sflag [#allocation3], %s368_s12 }
 0xc4c   : > { %vm1553_vm13 = vcmp.eq.s32.totalorder %v2718_v31, %v1552_v54  ;;  %vm1554_vm14 = vcmp.eq.s32.totalorder %v2720_v32, %v1552_v54  ;;  %vm1555_vm15 = vcmp.eq.s32.totalorder %v2722_v33, %v1552_v54 }
 0xc4d   : > { %v1556_v18 = vsel %vm1553_vm13, -inf, %v2925_v56  ;;  %v1557_v2 = vsel %vm1554_vm14, -inf, %v2928_v58  ;;  %v1558_v53 = vsel %vm1555_vm15, -inf, %v2931_v59 }
 0xc4e   : > { %v1560_v49 = vsel %vm796_vm7, %v1556_v18, -inf  ;;  %v1561_v60 = vsel %vm796_vm7, %v1557_v2, -inf  ;;  %v1562_v19 = vsel %vm796_vm7, %v1558_v53, -inf }
 0xc4f   : > { %v1563_v61 = vmax.f32 %v1560_v49, %v1561_v60 }
 0xc51   : > { %v1564_v31 = vmax.f32 %v1563_v61, %v1562_v19 }
 0xc53   : > { %1565 = vmax.xlane.f32.xlu0 %v1564_v31 }
 0xc54   : > { %2381 = shalt.err (!%p2378_p3)
}
 0xc55   : > { %s2382_s12 = scalar_lea.hbm %s2972_s28, 32  ;;  %s2386_s27 = scalar_lea.hbm %s3033_s10, 64 }
 0xc56   : > { %p2383_p4 = scmp.ne.s32.totalorder %s2972_s28, %s2382_s12  ;;  %p2387_p9 = scmp.lt.u32.totalorder %s2972_s28, %s3033_s10 }
 0xc57   : > { %p2388_p10 = scmp.lt.u32.totalorder %s2386_s27, %s2382_s12  ;;  %p2390_p12 = scmp.lt.u32.totalorder %s2382_s12, %s2972_s28 }
 0xc58   : > { %p2384_p7 = pnand %p2383_p4, %p2535_p5 }
 0xc59   : > { %p2389_p11 = por %p2388_p10, %p2387_p9 }
 0xc5a   : > { %p2385_p8 = pneg %p2384_p7 }
 0xc5b   : > { %p2391_p13 = por %p2390_p12, %p2389_p11 }
 0xc5d   : > { %p2392_p0 = pnand %p2391_p13, %p2385_p8 }
 0xc5f   : > { %2395 = shalt.err (!%p2392_p0)
}
 0xc60   : > { %s2440_s0 = smov 16   ;;  %s2441_s1 = smov 1  }
 0xc61   : > { %2244 = dma.vmem_to_hbm [thread:$0]  (%p2535_p5), %s2974_s25, 32, %s2972_s28, %s2978_s11, %s2440_s0, %s2440_s0, %s2441_s1  }
 0xc62   : > { %s1559_s12 = sadd.f32 %s2939_s20, %s2901_s30 }
 0xce0   : > { %v1566_v32 = vpop.xlane.xlu0 %1565 }
 0xce1   : > { %v1567_v33 = vrot.slane %v1566_v32, 4 }
 0xce3   : > { %v1568_v56 = vmax.f32 %v1566_v32, %v1567_v33 }
 0xce5   : > { %v1569_v58 = vrot.slane %v1568_v56, 2 }
 0xce7   : > { %v1570_v59 = vmax.f32 %v1568_v56, %v1569_v58 }
 0xce9   : > { %v1571_v20 = vrot.slane %v1570_v59, 1 }
 0xceb   : > { %v1572_v17 = vmax.f32 %v1570_v59, %v1571_v20 }
 0xced   : > { %2242 = vpush %v1572_v17 }
 0xd1e   : > { %s2243_s18 = spop %2242 }
 0xd1f   : > { %s1574_s21 = sadd.f32 %s2243_s18, %s1559_s12 }
 0xd21   : > { %s1575_s27 = smul.f32 0.33333334, %s1574_s21 }
 0xd23   : > { %v1576_v21 = vstv %s1575_s27 }
 0xd24   : > { %2040 = vst.msk [vmem:[%s2908_s26 + $0x1] sm:$0x1] %vm987_vm6, %v1576_v21 }
 0xd25 PF: > { %p2250_p5 = scmp.ge.s32.totalorder %s2430_s16, 2  ;;  %s1880_s23 = sand.u32 1, %s2418_s13  }
 0xd26   : > { %s1881_s25 = scalar_lea.sflag [#allocation3], %s1880_s23 }
 0xd27   : > { %p2247_p1 = pnand %p2250_p5, %p2539_p6 }
 0xd29   : > { %2413 = dma.done.wait (!%p2247_p1), %s1881_s25, 32  }
 0xd2a   : > { %2415 = vsyncadd (!%p2247_p1), %s1881_s25, 4294967264  ;;  %p21_p2 = scmp.ge.s32.totalorder %s2522_s19, 4   ;;  %s3042_s13 = smov %s2422_s14 }
 0xd2b   : > { %s3043_s14 = smov %s2426_s15  ;;  %s3044_s15 = smov %s2533_s22 }
 0xd2c   : > { %s3045_s16 = smov %s2522_s19  ;;  %23 = sbr.rel (!%p21_p2) target bundleno = 6 (0x6), region = 114 }
 0xd33   :  { %1886 = vsyncpa [#allocation3], 1 }
 0xd34   :  { %1888 = vsyncpa [#allocation3 + $0x1], 1 }

</bundles_post_ra>
